<compile_context>
chip_gen: v7x
topology: tpu7x:2x2x1
jax: 0.10.0
libtpu: 0.0.40
codegen_flags: <defaults>
</compile_context>

<pallas_src>
import jax
import jax.numpy as jnp
from jax.experimental import pallas as pl
from jax.experimental.pallas import tpu as pltpu


def _mlp_kernel(x_ref, wg_ref, wu_ref, wd_ref, o_ref, acc_ref):
    # x_ref : [tm, H]  bf16          wg_ref/wu_ref : [H, ti] bf16
    # wd_ref: [ti, H]  bf16          o_ref         : [tm, H] bf16
    # acc   : [tm, H]  f32 VMEM scratch, resident across the I grid axis
    i = pl.program_id(1)

    @pl.when(i == 0)
    def _():
        acc_ref[...] = jnp.zeros_like(acc_ref)

    x = x_ref[...]
    gate = jnp.dot(x, wg_ref[...], preferred_element_type=jnp.float32)
    up = jnp.dot(x, wu_ref[...], preferred_element_type=jnp.float32)
    # SiLU(gate) * up in f32 (sigmoid on the EUP), cast to bf16 only for the MXU.
    act = (gate * jax.nn.sigmoid(gate) * up).astype(wd_ref.dtype)
    acc_ref[...] += jnp.dot(act, wd_ref[...], preferred_element_type=jnp.float32)

    @pl.when(i == pl.num_programs(1) - 1)
    def _():
        o_ref[...] = acc_ref[...].astype(o_ref.dtype)


def llama_mlp(x, w_gate, w_up, w_down, *, tm=128, ti=256):
    """Fused LlamaMLP forward.  x: [T, H]; w_gate/w_up: [H, I]; w_down: [I, H]."""
    T, H = x.shape
    I = w_gate.shape[1]
    tm = min(tm, T)
    ti = min(ti, I)
    assert T % tm == 0 and I % ti == 0, "token / intermediate dims must tile evenly"
    # TODO(synk): tensor-parallel sharding + all-reduce of RowParallelLinear is
    # distributed-serving glue, not kernel math; single-shard semantics here.

    grid = (T // tm, I // ti)
    return pl.pallas_call(
        _mlp_kernel,
        out_shape=jax.ShapeDtypeStruct((T, H), x.dtype),
        grid_spec=pltpu.PrefetchScalarGridSpec(
            num_scalar_prefetch=0,
            grid=grid,
            in_specs=[
                pl.BlockSpec((tm, H), lambda m, i: (m, 0)),   # x row block
                pl.BlockSpec((H, ti), lambda m, i: (0, i)),   # W_gate col block
                pl.BlockSpec((H, ti), lambda m, i: (0, i)),   # W_up   col block
                pl.BlockSpec((ti, H), lambda m, i: (i, 0)),   # W_down row block
            ],
            out_specs=pl.BlockSpec((tm, H), lambda m, i: (m, 0)),
            scratch_shapes=[pltpu.VMEM((tm, H), jnp.float32)],
        ),
        compiler_params=pltpu.CompilerParams(
            dimension_semantics=("parallel", "arbitrary"),
        ),
    )(x, w_gate, w_up, w_down)


# ------------------------------ pure-JAX reference ---------------------------
def ref_mlp(x, w_gate, w_up, w_down):
    xf = x.astype(jnp.float32)
    gate = xf @ w_gate.astype(jnp.float32)
    up = xf @ w_up.astype(jnp.float32)
    return (jax.nn.silu(gate) * up) @ w_down.astype(jnp.float32)


# ----------------------------------- main ------------------------------------
if __name__ == "__main__":
    # Small but lane-dense shapes (multiples of 128 -> full unmasked vector
    # stores, clean (8,128) tiling, 2x2 grid exercising both axes).
    T, H, I = 256, 256, 512

    key = jax.random.PRNGKey(0)
    kx, kg, ku, kd = jax.random.split(key, 4)
    scale = 0.05
    x = jax.random.normal(kx, (T, H), jnp.float32).astype(jnp.bfloat16)
    w_gate = (scale * jax.random.normal(kg, (H, I), jnp.float32)).astype(jnp.bfloat16)
    w_up = (scale * jax.random.normal(ku, (H, I), jnp.float32)).astype(jnp.bfloat16)
    w_down = (scale * jax.random.normal(kd, (I, H), jnp.float32)).astype(jnp.bfloat16)

    out = llama_mlp(x, w_gate, w_up, w_down)
    out = jax.block_until_ready(out)

    ref = ref_mlp(x, w_gate, w_up, w_down)
    assert out.shape == (T, H) and out.dtype == jnp.bfloat16
    assert jnp.allclose(out.astype(jnp.float32), ref, atol=1e-2, rtol=2e-2), \
        "output mismatch"

    print("KERNEL_OK")
</pallas_src>

<mosaic_0001>
module attributes {stable_mosaic.version = 11 : i64} {
  func.func @_mlp_kernel(%arg0: i32, %arg1: i32, %arg2: memref<128x256xbf16, #tpu.memory_space<vmem>>, %arg3: memref<256x256xbf16, #tpu.memory_space<vmem>>, %arg4: memref<256x256xbf16, #tpu.memory_space<vmem>>, %arg5: memref<256x256xbf16, #tpu.memory_space<vmem>>, %arg6: memref<128x256xbf16, #tpu.memory_space<vmem>>, %arg7: memref<128x256xf32, #tpu.memory_space<vmem>>) attributes {dimension_semantics = [#tpu.dimension_semantics<parallel>, #tpu.dimension_semantics<arbitrary>], iteration_bounds = array<i64: 2, 2>, scalar_prefetch = 0 : i64, scratch_operands = 1 : i64, tpu.core_type = #tpu.core_type<tc>, window_params = [{transform_indices = @transform_0, window_bounds = array<i64: 128, 256>}, {transform_indices = @transform_1, window_bounds = array<i64: 256, 256>}, {transform_indices = @transform_2, window_bounds = array<i64: 256, 256>}, {transform_indices = @transform_3, window_bounds = array<i64: 256, 256>}, {transform_indices = @transform_4, window_bounds = array<i64: 128, 256>}]} {
    %c0_i32 = arith.constant 0 : i32
    %0 = arith.cmpi eq, %arg1, %c0_i32 : i32
    %1 = arith.extui %0 : i1 to i32
    %c0_i32_0 = arith.constant 0 : i32
    %2 = arith.cmpi ne, %1, %c0_i32_0 : i32
    scf.if %2 {
      %cst_16 = arith.constant 0.000000e+00 : f32
      %24 = vector.broadcast %cst_16 : f32 to vector<128x256xf32>
      %c0_17 = arith.constant 0 : index
      %c0_18 = arith.constant 0 : index
      %25 = vector.load %arg7[%c0_17, %c0_18] : memref<128x256xf32, #tpu.memory_space<vmem>>, vector<128x256xf32>
      tpu.vector_store %arg7[%c0_17, %c0_18], %24 {strides = array<i32>} : memref<128x256xf32, #tpu.memory_space<vmem>>, vector<128x256xf32>,
    } else {
    }
    %c0 = arith.constant 0 : index
    %c0_1 = arith.constant 0 : index
    %3 = vector.load %arg2[%c0, %c0_1] : memref<128x256xbf16, #tpu.memory_space<vmem>>, vector<128x256xbf16>
    %c0_2 = arith.constant 0 : index
    %c0_3 = arith.constant 0 : index
    %4 = vector.load %arg3[%c0_2, %c0_3] : memref<256x256xbf16, #tpu.memory_space<vmem>>, vector<256x256xbf16>
    %cst = arith.constant dense<0.000000e+00> : vector<128x256xf32>
    %5 = tpu.matmul %3, %4, %cst {dimension_numbers = #tpu.dot_dimension_numbers<[1], [0], [0], [1], [0, 0, 1, 1], [], []>} : vector<128x256xbf16>, vector<256x256xbf16>, vector<128x256xf32> -> vector<128x256xf32>
    %c0_4 = arith.constant 0 : index
    %c0_5 = arith.constant 0 : index
    %6 = vector.load %arg4[%c0_4, %c0_5] : memref<256x256xbf16, #tpu.memory_space<vmem>>, vector<256x256xbf16>
    %cst_6 = arith.constant dense<0.000000e+00> : vector<128x256xf32>
    %7 = tpu.matmul %3, %6, %cst_6 {dimension_numbers = #tpu.dot_dimension_numbers<[1], [0], [0], [1], [0, 0, 1, 1], [], []>} : vector<128x256xbf16>, vector<256x256xbf16>, vector<128x256xf32> -> vector<128x256xf32>
    %8 = arith.negf %5 : vector<128x256xf32>
    %9 = math.exp %8 : vector<128x256xf32>
    %cst_7 = arith.constant 1.000000e+00 : f32
    %10 = vector.broadcast %cst_7 : f32 to vector<128x256xf32>
    %11 = arith.addf %10, %9 : vector<128x256xf32>
    %12 = arith.divf %10, %11 : vector<128x256xf32>
    %13 = arith.mulf %5, %12 : vector<128x256xf32>
    %14 = arith.mulf %13, %7 : vector<128x256xf32>
    %15 = arith.truncf %14 : vector<128x256xf32> to vector<128x256xbf16>
    %c0_8 = arith.constant 0 : index
    %c0_9 = arith.constant 0 : index
    %16 = vector.load %arg7[%c0_8, %c0_9] : memref<128x256xf32, #tpu.memory_space<vmem>>, vector<128x256xf32>
    %c0_10 = arith.constant 0 : index
    %c0_11 = arith.constant 0 : index
    %17 = vector.load %arg5[%c0_10, %c0_11] : memref<256x256xbf16, #tpu.memory_space<vmem>>, vector<256x256xbf16>
    %cst_12 = arith.constant dense<0.000000e+00> : vector<128x256xf32>
    %18 = tpu.matmul %15, %17, %cst_12 {dimension_numbers = #tpu.dot_dimension_numbers<[1], [0], [0], [1], [0, 0, 1, 1], [], []>} : vector<128x256xbf16>, vector<256x256xbf16>, vector<128x256xf32> -> vector<128x256xf32>
    %19 = arith.addf %16, %18 : vector<128x256xf32>
    %c0_13 = arith.constant 0 : index
    %c0_14 = arith.constant 0 : index
    %20 = vector.load %arg7[%c0_13, %c0_14] : memref<128x256xf32, #tpu.memory_space<vmem>>, vector<128x256xf32>
    tpu.vector_store %arg7[%c0_13, %c0_14], %19 {strides = array<i32>} : memref<128x256xf32, #tpu.memory_space<vmem>>, vector<128x256xf32>,
    %c1_i32 = arith.constant 1 : i32
    %21 = arith.cmpi eq, %arg1, %c1_i32 : i32
    %22 = arith.extui %21 : i1 to i32
    %c0_i32_15 = arith.constant 0 : i32
    %23 = arith.cmpi ne, %22, %c0_i32_15 : i32
    scf.if %23 {
      %c0_16 = arith.constant 0 : index
      %c0_17 = arith.constant 0 : index
      %24 = vector.load %arg7[%c0_16, %c0_17] : memref<128x256xf32, #tpu.memory_space<vmem>>, vector<128x256xf32>
      %25 = arith.truncf %24 : vector<128x256xf32> to vector<128x256xbf16>
      %c0_18 = arith.constant 0 : index
      %c0_19 = arith.constant 0 : index
      %26 = vector.load %arg6[%c0_18, %c0_19] : memref<128x256xbf16, #tpu.memory_space<vmem>>, vector<128x256xbf16>
      tpu.vector_store %arg6[%c0_18, %c0_19], %25 {strides = array<i32>} : memref<128x256xbf16, #tpu.memory_space<vmem>>, vector<128x256xbf16>,
    } else {
    }
    return
  }
  func.func @transform_0(%arg0: i32, %arg1: i32) -> (i32, i32) {
    %c0_i32 = arith.constant 0 : i32
    %c0_i32_0 = arith.constant 0 : i32
    return %arg0, %c0_i32 : i32, i32
  }
  func.func @transform_1(%arg0: i32, %arg1: i32) -> (i32, i32) {
    %c0_i32 = arith.constant 0 : i32
    %c0_i32_0 = arith.constant 0 : i32
    return %c0_i32, %arg1 : i32, i32
  }
  func.func @transform_2(%arg0: i32, %arg1: i32) -> (i32, i32) {
    %c0_i32 = arith.constant 0 : i32
    %c0_i32_0 = arith.constant 0 : i32
    return %c0_i32, %arg1 : i32, i32
  }
  func.func @transform_3(%arg0: i32, %arg1: i32) -> (i32, i32) {
    %c0_i32 = arith.constant 0 : i32
    %c0_i32_0 = arith.constant 0 : i32
    return %arg1, %c0_i32 : i32, i32
  }
  func.func @transform_4(%arg0: i32, %arg1: i32) -> (i32, i32) {
    %c0_i32 = arith.constant 0 : i32
    %c0_i32_0 = arith.constant 0 : i32
    return %arg0, %c0_i32 : i32, i32
  }
}

</mosaic_0001>

<bundles_post_ra>
// kernel: tpu_custom_call.1
= control target key start
LH: loop header
LB: loop body
LE: loop exit
PB: predicated region body
PF: predicated region fallthrough
CT: control target
= control target key end

     0   :  { %s3797_s0 = inlined_call_operand.hbm [shape: bf16[256,256], index: 0, kind: input, shape index: {}]   ;;  %s3798_s1 = inlined_call_operand.hbm [shape: bf16[256,512], index: 1, kind: input, shape index: {}]   ;;  %s3799_s2 = inlined_call_operand.hbm [shape: bf16[256,512], index: 2, kind: input, shape index: {}]   ;;  %s3800_s3 = inlined_call_operand.hbm [shape: bf16[512,256], index: 3, kind: input, shape index: {}]   ;;  %s3801_s4 = inlined_call_operand.hbm [shape: bf16[256,256], index: 4, kind: output, shape index: {}]  }
   0x1   :  { %3824 = sst [smem:[#allocation26_spill]] %s3798_s1 }
   0x2   :  { %3825 = sst [smem:[#allocation27_spill]] %s3801_s4 }
   0x3   :  { %9 = vsyncpa [#allocation4], 0 }
   0x4   :  { %11 = vsyncpa [#allocation4 + $0x1], 0 }
   0x5   :  { %12 = vsyncpa [#allocation7], 0 }
   0x6   :  { %14 = vsyncpa [#allocation7 + $0x1], 0 }
   0x7   :  { %15 = vsyncpa [#allocation10], 0 }
   0x8   :  { %17 = vsyncpa [#allocation10 + $0x1], 0 }
   0x9   :  { %18 = vsyncpa [#allocation5], 0 }
   0xa   :  { %20 = vsyncpa [#allocation5 + $0x1], 0  ;;  %s3035_s15 = smov 0   ;;  %s3037_s16 = smov 0  }
   0xb   :  { %s3039_s17 = smov 0   ;;  %s3041_s18 = smov 0  }
   0xc   :  { %s3043_s19 = smov 0   ;;  %s3045_s20 = smov 0  }
   0xd   :  { %s3047_s21 = smov 0   ;;  %s3049_s22 = smov 0  }
   0xe   :  { %s3051_s23 = smov 0   ;;  %s3053_s24 = smov 0  }
   0xf   :  { %s3055_s25 = smov 0  }
  0x10 LB: > { %3826 = sst [smem:[#allocation16_spill]] %s2961_s16  ;;  %s35_s26 = sadd.s32 1, %s2989_s23  ;;  %s2997_s25 = sphi %s3055_s25, %s26_s25   ;;  %s2993_s24 = sphi %s3053_s24, %s3880_s24   ;;  %s2989_s23 = sphi %s3051_s23, %s3879_s23   ;;  %s2985_s22 = sphi %s3049_s22, %s3871_s22   ;;  %s2981_s21 = sphi %s3047_s21, %s3878_s21   ;;  %s2977_s20 = sphi %s3045_s20, %s3870_s20   ;;  %s2973_s19 = sphi %s3043_s19, %s3877_s19   ;;  %s2969_s18 = sphi %s3041_s18, %s3876_s18   ;;  %s2965_s17 = sphi %s3039_s17, %s3875_s17   ;;  %s2961_s16 = sphi %s3037_s16, %s3874_s16   ;;  %s2957_s15 = sphi %s3035_s15, %s3867_s15  }
  0x11   : > { %3827 = sst [smem:[#allocation17_spill]] %s2977_s20  ;;  %p3806_p0 = scmp.eq.s32.totalorder %s2997_s25, 0 }
  0x12   : > { %3828 = sst [smem:[#allocation18_spill]] %s2981_s21  ;;  %p3092_p1 = scmp.ge.s32.totalorder %s35_s26, 2 }
  0x13   : > { %3829 = sst [smem:[#allocation19_spill]] %s2985_s22  ;;  %s71_s28 = sadd.s32 1, %s2965_s17 }
  0x14   : > { %3830 = sst [smem:[#allocation20_spill]] %s2993_s24  ;;  %p78_p2 = scmp.ne.s32.totalorder %s2965_s17, %s2961_s16 }
  0x15   : > { %s3831_s27 = scalar_select %p3092_p1, 1, 0 }
  0x16   : > { %s3882_s26 = smov (%p3092_p1, %s35_s26), 0  ;;  %p80_p4 = por %p78_p2, %p3806_p0 }
  0x17   : > { %3832 = sst [smem:[#allocation21_spill]] %s3882_s26  ;;  %s68_s29 = ssub.s32 %s2989_s23, %s3882_s26 }
  0x18   : > { %p3805_p5 = scmp.lt.s32.totalorder %s2997_s25, 4  ;;  %p69_p6 = scmp.eq.s32.totalorder %s68_s29, 0 }
  0x19   : > { %s208_s30 = sand.u32 1, %s2997_s25   ;;  %s3802_s6 = sand.u32 1, %s2965_s17  }
  0x1a   : > { %s3112_s5 = scalar_select %p69_p6, %s2965_s17, %s71_s28  }
  0x1b   : > { %s3117_s7 = sshll.u32 %s3802_s6, 8  ;;  %s2274_s8 = sshll.u32 %s2989_s23, 7 }
  0x1c   : > { %3833 = sst [smem:[#allocation22_spill]] %s3112_s5  ;;  %s3834_s1 = sld [smem:[#allocation26_spill]] }
  0x1d   : > { %s212_s12 = scalar_lea.vmem [#allocation6], %s3117_s7  ;;  %p3128_p7 = pnand %p3805_p5, %p80_p4 }
  0x1e   : > { %s219_s13 = sshll.u32 %s212_s12, 4  ;;  %s3137_s9 = scalar_lea.hbm %s3799_s2, %s2274_s8  ;;  %s3132_s13 = int_to_ptr.vmem [resolvable:$true] %s219_s13 }
  0x1f   : > { %s3835_s14 = scalar_select %p3128_p7, 1, 0 }
  0x20   : > { %s3139_s10 = scalar_lea.sflag [#allocation7], %s208_s30  ;;  %p3145_p9 = pneg %p3128_p7 }
  0x22   : > { %s3123_s11 = scalar_lea.hbm %s3834_s1, %s2274_s8  ;;  %s2752_s4 = scalar_lea.hbm %s3834_s1, 8192 }
  0x23   : > { %s2747_s6 = scalar_lea.hbm %s3123_s11, 4096  ;;  %p2753_p12 = scmp.lt.u32.totalorder %s3123_s11, %s3834_s1 }
  0x24   : > { %p2748_p8 = scmp.ne.s32.totalorder %s3123_s11, %s2747_s6  ;;  %p2754_p13 = scmp.lt.u32.totalorder %s2752_s4, %s2747_s6 }
  0x25   : > { %p2756_p4 = scmp.lt.u32.totalorder %s2747_s6, %s3123_s11 }
  0x26   : > { %p2750_p10 = pnand %p3145_p9, %p2748_p8  ;;  %p2755_p2 = por %p2754_p13, %p2753_p12 }
  0x28   : > { %p2751_p11 = pneg %p2750_p10  ;;  %p2757_p6 = por %p2756_p4, %p2755_p2 }
  0x2a   : > { %p2758_p5 = pnand %p2757_p6, %p2751_p11 }
  0x2c   : > { %2761 = shalt.err (!%p2758_p5)
}
  0x2d   : > { %s2762_s30 = scalar_lea.vmem %s3132_s13, 4096  ;;  %s2999_s26 = smov [#allocation6]  }
  0x2e   : > { %p2763_p8 = scmp.ne.s32.totalorder %s3132_s13, %s2762_s30  ;;  %s2767_s5 = sshll.u32 %s2999_s26, 4  ;;  %s2768_s5 = int_to_ptr.vmem [resolvable:$false] %s2767_s5 }
  0x2f   : > { %s2769_s29 = scalar_lea.vmem %s2768_s5, 8192  ;;  %p2770_p0 = scmp.lt.s32.totalorder %s3132_s13, %s2768_s5 }
  0x30   : > { %p2765_p10 = pnand %p2763_p8, %p3145_p9  ;;  %p2771_p1 = scmp.lt.s32.totalorder %s2769_s29, %s2762_s30 }
  0x32   : > { %p2766_p3 = pneg %p2765_p10  ;;  %p2772_p12 = por %p2771_p1, %p2770_p0 }
  0x34   : > { %p2773_p13 = pnand %p2772_p12, %p2766_p3 }
  0x36   : > { %2776 = shalt.err (!%p2773_p13)
}
  0x37   : > { %s3808_s4 = smov 256   ;;  %s3809_s6 = smov 128  }
  0x38   : > { %s3811_s28 = smov 8   ;;  %p2098_p0 = scmp.ge.s32.totalorder %s2997_s25, 1 }
  0x39   : > { %2344 = dma.hbm_to_vmem [thread:$0]  (!%p3128_p7), %s3123_s11, 4096, %s3132_s13, %s3139_s10, %s3808_s4, %s3809_s6, %s3811_s28  }
  0x3a   : > { %p270_p1 = scmp.lt.s32.totalorder %s2997_s25, 5  ;;  %s3179_s30 = sadd.s32 4294967295, %s2997_s25  }
  0x3b   : > { %s2081_s26 = sadd.s32 4294967294, %s2997_s25   ;;  %s38_s5 = sadd.s32 1, %s2993_s24 }
  0x3c   : > { %p3174_p3 = pnand %p2098_p0, %p270_p1  ;;  %p3838_p5 = scmp.ne.s32.totalorder %s3831_s27, 0 }
  0x3d   : > { %s45_s11 = sadd.s32 1, %s2977_s20  ;;  %p52_p11 = scmp.ne.s32.totalorder %s2977_s20, %s2973_s19 }
  0x3e   : > { %s3837_s8 = scalar_select %p3174_p3, 1, 0 }
  0x3f   : > { %s3884_s5 = smov (!%p3838_p5, %s38_s5), %s2993_s24  ;;  %p58_p4 = scmp.ne.s32.totalorder %s2973_s19, %s2969_s18 }
  0x40   : > { %p40_p2 = scmp.ge.s32.totalorder %s3884_s5, 2  ;;  %p3839_p6 = scmp.eq.s32.totalorder %s2997_s25, 0 }
  0x41   : > { %p59_p10 = scmp.eq.s32.totalorder %s3179_s30, 0  ;;  %p3843_p13 = scmp.ne.s32.totalorder %s2961_s16, %s2957_s15 }
  0x42   : > { %p3193_p8 = por %p3839_p6, %p52_p11  ;;  %s3886_s5 = smov (%p40_p2, %s3884_s5), 0 }
  0x43   : > { %3841 = sst [smem:[#allocation23_spill]] %s3886_s5  ;;  %p3203_p12 = por %p59_p10, %p58_p4 }
  0x44   : > { %p3210_p0 = por %p3843_p13, %p59_p10  ;;  %s42_s4 = ssub.s32 %s2993_s24, %s3886_s5 }
  0x45   : > { %s3842_s27 = scalar_select %p3203_p12, 1, 0 }
  0x46   : > { %s3844_s29 = scalar_select %p3210_p0, 1, 0 }
  0x47   : > { %p160_p1 = scmp.eq.s32.totalorder %s3179_s30, 3  ;;  %p43_p5 = scmp.eq.s32.totalorder %s42_s4, 0 }
  0x48   : > { %3845 = sst [smem:[#allocation24_spill]] %s3844_s29  ;;  %p166_p6 = scmp.eq.s32.totalorder %s2081_s26, 3 }
  0x49   : > { %p3217_p2 = por %p160_p1, %p52_p11  ;;  %s186_s28 = sand.u32 1, %s2977_s20  }
  0x4a   : > { %s3223_s1 = scalar_select %p43_p5, %s2977_s20, %s45_s11  }
  0x4b   : > { %s3846_s6 = scalar_select %p3217_p2, 1, 0 }
  0x4c   : > { %3847 = sst [smem:[#allocation25_spill]] %s3223_s1  ;;  %p3228_p3 = por %p166_p6, %p58_p4 }
  0x4d   : > { %s2084_s15 = sshll.u32 %s186_s28, 7  ;;  %s2273_s21 = sshll.u32 %s2993_s24, 11 }
  0x4e   : > { %s3848_s22 = scalar_select %p3228_p3, 1, 0 }
  0x4f   : > { %s3236_s5 = scalar_lea.hbm %s3797_s0, %s2273_s21  ;;  %s190_s4 = scalar_lea.vmem [#allocation3], %s2084_s15 }
  0x50   : > { %s198_s26 = sshll.u32 %s190_s4, 4  ;;  %p3849_p11 = scmp.lt.s32.totalorder %s2997_s25, 4  ;;  %s3246_s26 = int_to_ptr.vmem [resolvable:$true] %s198_s26 }
  0x51   : > { %s233_s24 = scalar_lea.vmem [#allocation8], %s3117_s7  ;;  %s3251_s21 = scalar_lea.sflag [#allocation4], %s186_s28 }
  0x52   : > { %p3242_p10 = pnand %p3849_p11, %p3193_p8  ;;  %s3249_s16 = sshll.u32 %s233_s24, 4  ;;  %s3283_s16 = int_to_ptr.vmem [resolvable:$true] %s3249_s16 }
  0x53   : > { %s2777_s29 = scalar_lea.hbm %s3236_s5, 2048  ;;  %s2782_s4 = scalar_lea.hbm %s3797_s0, 4096 }
  0x54   : > { %p2778_p4 = scmp.ne.s32.totalorder %s3236_s5, %s2777_s29  ;;  %p2779_p13 = pneg %p3242_p10 }
  0x55   : > { %p2783_p5 = scmp.lt.u32.totalorder %s3236_s5, %s3797_s0  ;;  %p2784_p6 = scmp.lt.u32.totalorder %s2782_s4, %s2777_s29 }
  0x56   : > { %p2780_p1 = pnand %p2779_p13, %p2778_p4  ;;  %p2786_p3 = scmp.lt.u32.totalorder %s2777_s29, %s3236_s5 }
  0x57   : > { %p2785_p11 = por %p2784_p6, %p2783_p5 }
  0x58   : > { %p2781_p8 = pneg %p2780_p1 }
  0x59   : > { %p2787_p2 = por %p2786_p3, %p2785_p11 }
  0x5b   : > { %p2788_p0 = pnand %p2787_p2, %p2781_p8 }
  0x5d   : > { %2791 = shalt.err (!%p2788_p0)
}
  0x5e   : > { %s2792_s24 = scalar_lea.vmem %s3246_s26, 2048  ;;  %s3003_s28 = smov [#allocation3]  }
  0x5f   : > { %p2793_p4 = scmp.ne.s32.totalorder %s3246_s26, %s2792_s24  ;;  %s2797_s13 = sshll.u32 %s3003_s28, 4  ;;  %s2798_s13 = int_to_ptr.vmem [resolvable:$false] %s2797_s13 }
  0x60   : > { %s2799_s1 = scalar_lea.vmem %s2798_s13, 4096  ;;  %p2800_p7 = scmp.lt.s32.totalorder %s3246_s26, %s2798_s13 }
  0x61   : > { %p2795_p1 = pnand %p2793_p4, %p2779_p13  ;;  %p2801_p5 = scmp.lt.s32.totalorder %s2799_s1, %s2792_s24 }
  0x63   : > { %p2796_p12 = pneg %p2795_p1  ;;  %p2802_p6 = por %p2801_p5, %p2800_p7 }
  0x65   : > { %p2803_p3 = pnand %p2802_p6, %p2796_p12 }
  0x67   : > { %2806 = shalt.err (!%p2803_p3)
}
  0x68   : > { %s3851_s20 = smov 8   ;;  %s3852_s29 = smov 128  }
  0x69   : > { %2341 = dma.hbm_to_vmem [thread:$0]  (!%p3242_p10), %s3236_s5, 2048, %s3246_s26, %s3251_s21, %s3852_s29, %s3852_s29, %s3851_s20  }
  0x6a   : > { %s2807_s15 = scalar_lea.hbm %s3137_s9, 4096  ;;  %s2812_s24 = scalar_lea.hbm %s3799_s2, 8192 }
  0x6b   : > { %p2808_p7 = scmp.ne.s32.totalorder %s3137_s9, %s2807_s15  ;;  %p2813_p2 = scmp.lt.u32.totalorder %s3137_s9, %s3799_s2 }
  0x6c   : > { %p2814_p13 = scmp.lt.u32.totalorder %s2812_s24, %s2807_s15  ;;  %p2816_p11 = scmp.lt.u32.totalorder %s2807_s15, %s3137_s9 }
  0x6d   : > { %p2810_p12 = pnand %p2808_p7, %p3145_p9 }
  0x6e   : > { %p2815_p8 = por %p2814_p13, %p2813_p2 }
  0x6f   : > { %p2811_p0 = pneg %p2810_p12 }
  0x70   : > { %p2817_p4 = por %p2816_p11, %p2815_p8 }
  0x72   : > { %p2818_p10 = pnand %p2817_p4, %p2811_p0 }
  0x74   : > { %2821 = shalt.err (!%p2818_p10)
}
  0x75   : > { %s2822_s5 = scalar_lea.vmem %s3283_s16, 4096  ;;  %s3004_s26 = smov [#allocation8]  }
  0x76   : > { %p2823_p1 = scmp.ne.s32.totalorder %s3283_s16, %s2822_s5  ;;  %s2827_s21 = sshll.u32 %s3004_s26, 4  ;;  %s2828_s21 = int_to_ptr.vmem [resolvable:$false] %s2827_s21 }
  0x77   : > { %s2829_s1 = scalar_lea.vmem %s2828_s21, 8192  ;;  %p2830_p3 = scmp.lt.s32.totalorder %s3283_s16, %s2828_s21 }
  0x78   : > { %p2825_p5 = pnand %p2823_p1, %p3145_p9  ;;  %p2831_p7 = scmp.lt.s32.totalorder %s2829_s1, %s2822_s5 }
  0x7a   : > { %p2826_p6 = pneg %p2825_p5  ;;  %p2832_p12 = por %p2831_p7, %p2830_p3 }
  0x7c   : > { %p2833_p2 = pnand %p2832_p12, %p2826_p6 }
  0x7e   : > { %2836 = shalt.err (!%p2833_p2)
}
  0x7f   : > { %p3853_p0 = scmp.ne.s32.totalorder %s3835_s14, 0  ;;  %s3854_s15 = smov 256  }
  0x80   : > { %s2277_s11 = sshll.u32 %s2989_s23, 12  ;;  %s254_s13 = scalar_lea.vmem [#allocation9], %s3117_s7 }
  0x81   : > { %2347 = dma.hbm_to_vmem [thread:$0]  (!%p3853_p0), %s3137_s9, 4096, %s3283_s16, %s3139_s10, %s3854_s15, %s3852_s29, %s3851_s20  }
  0x82   : > { %s3314_s28 = scalar_lea.hbm %s3800_s3, %s2277_s11  ;;  %s262_s5 = sshll.u32 %s254_s13, 4  ;;  %s3317_s5 = int_to_ptr.vmem [resolvable:$true] %s262_s5 }
  0x83   : > { %s3855_s26 = sand.u32 1, %s2965_s17   ;;  %s2837_s1 = scalar_lea.hbm %s3314_s28, 4096 }
  0x84   : > { %s3321_s21 = scalar_lea.sflag [#allocation10], %s3855_s26  ;;  %p2838_p13 = scmp.ne.s32.totalorder %s3314_s28, %s2837_s1 }
  0x85   : > { %s2842_s16 = scalar_lea.hbm %s3800_s3, 8192  ;;  %p2843_p4 = scmp.lt.u32.totalorder %s3314_s28, %s3800_s3 }
  0x86   : > { %p2840_p8 = pnand %p2838_p13, %p3145_p9  ;;  %p2844_p10 = scmp.lt.u32.totalorder %s2842_s16, %s2837_s1 }
  0x87   : > { %p2846_p5 = scmp.lt.u32.totalorder %s2837_s1, %s3314_s28 }
  0x88   : > { %p2841_p11 = pneg %p2840_p8  ;;  %p2845_p1 = por %p2844_p10, %p2843_p4 }
  0x8a   : > { %p2847_p6 = por %p2846_p5, %p2845_p1 }
  0x8c   : > { %p2848_p3 = pnand %p2847_p6, %p2841_p11 }
  0x8e   : > { %2851 = shalt.err (!%p2848_p3)
}
  0x8f   : > { %s2852_s7 = scalar_lea.vmem %s3317_s5, 4096  ;;  %s3005_s4 = smov [#allocation9]  }
  0x90   : > { %p2853_p7 = scmp.ne.s32.totalorder %s3317_s5, %s2852_s7  ;;  %s2857_s24 = sshll.u32 %s3005_s4, 4  ;;  %s2858_s24 = int_to_ptr.vmem [resolvable:$false] %s2857_s24 }
  0x91   : > { %s2859_s13 = scalar_lea.vmem %s2858_s24, 8192  ;;  %p2860_p13 = scmp.lt.s32.totalorder %s3317_s5, %s2858_s24 }
  0x92   : > { %p2855_p12 = pnand %p2853_p7, %p3145_p9  ;;  %p2861_p8 = scmp.lt.s32.totalorder %s2859_s13, %s2852_s7 }
  0x94   : > { %p2856_p2 = pneg %p2855_p12  ;;  %p2862_p4 = por %p2861_p8, %p2860_p13 }
  0x96   : > { %p2863_p10 = pnand %p2862_p4, %p2856_p2 }
  0x98   : > { %2866 = shalt.err (!%p2863_p10)
}
  0x99   : > { %2350 = dma.hbm_to_vmem [thread:$0]  (!%p3853_p0), %s3314_s28, 4096, %s3317_s5, %s3321_s21, %s3852_s29, %s3852_s29, %s3851_s20  }
  0x9a   : > { %p3856_p9 = scmp.ne.s32.totalorder %s3837_s8, 0 }
  0x9b   : > { %s3351_s12 = sand.u32 (!%p3856_p9), 1, %s2973_s19   ;;  %p3857_p11 = scmp.ne.s32.totalorder (!%p3856_p9), %s3842_s27, 0 }
  0x9c   : > { %274 = sbr.rel (%p3856_p9) target bundleno = 829 (0x33d), region = 36  ;;  %s2099_s26 = sshll.u32 (!%p3856_p9), %s3351_s12, 7 }
  0x9d   : > { %s277_s1 = scalar_lea.sflag (!%p3856_p9), [#allocation4], %s3351_s12  ;;  %s3355_s9 = scalar_lea.vmem (!%p3856_p9), [#allocation3], %s2099_s26 }
  0xa3   : > { %2940 = dma.done.wait (%p3857_p11), %s277_s1, 2048  }
  0xa4   : > { %2942 = vsyncadd (%p3857_p11), %s277_s1, 4294965248  ;;  %s3858_s14 = sld [smem:[#allocation16_spill]]  ;;  %s3859_s20 = sld [smem:[#allocation24_spill]] }
  0xa5   : > { %s285_s8 = sand.u32 1, %s3179_s30  }
  0xa6   : > { %s286_s5 = scalar_lea.sflag [#allocation7], %s285_s8 }
  0xaa   : > { %s287_s29 = sand.u32 1, %s3858_s14   ;;  %p3860_p0 = scmp.ne.s32.totalorder %s3859_s20, 0 }
  0xab   : > { %s2100_s28 = sshll.u32 %s287_s29, 8 }
  0xac   : > { %s3363_s21 = scalar_lea.vmem [#allocation6], %s2100_s28 }
  0xad   : > { %2944 = dma.done.wait (%p3860_p0), %s286_s5, 8192  }
  0xae   : > { %2946 = vsyncadd (%p3860_p0), %s286_s5, 4294959104  ;;  %s3369_s10 = scalar_lea.vmem [#allocation8], %s2100_s28  ;;  %s304_s16 = scalar_lea.sflag [#allocation10], %s287_s29 }
  0xaf   : > { %s3371_s27 = scalar_lea.vmem [#allocation9], %s2100_s28 }
  0xb0   : > { %2948 = dma.done.wait (%p3860_p0), %s304_s16, 4096  }
  0xb1   : > { %2950 = vsyncadd (%p3860_p0), %s304_s16, 4294963200  ;;  %s3377_s30 = scalar_lea.vmem [#allocation11], %s2099_s26  ;;  %s3861_s15 = sld [smem:[#allocation18_spill]] }
  0xb7   : > { %p2104_p1 = scmp.ne.s32.totalorder %s3861_s15, 0 }
  0xb8   : > { %v3006_v0 = vmov (!%p2104_p1), 0.0  }
  0xb9   : > { %355 = sbr.rel (%p2104_p1) target bundleno = 201 (0xc9), region = 56  ;;  %356 = vst [vmem:[#allocation2] sm:$0xff] (!%p2104_p1), %v3006_v0  ;;  %357 = vst [vmem:[#allocation2 + $0x8] sm:$0xff] (!%p2104_p1), %v3006_v0 }
  0xba   : > { %358 = vst [vmem:[#allocation2 + $0x10] sm:$0xff] (!%p2104_p1), %v3006_v0  ;;  %359 = vst [vmem:[#allocation2 + $0x18] sm:$0xff] (!%p2104_p1), %v3006_v0 }
  0xbb   : > { %360 = vst [vmem:[#allocation2 + $0x20] sm:$0xff] (!%p2104_p1), %v3006_v0  ;;  %361 = vst [vmem:[#allocation2 + $0x28] sm:$0xff] (!%p2104_p1), %v3006_v0 }
  0xbc   : > { %362 = vst [vmem:[#allocation2 + $0x30] sm:$0xff] (!%p2104_p1), %v3006_v0  ;;  %363 = vst [vmem:[#allocation2 + $0x38] sm:$0xff] (!%p2104_p1), %v3006_v0 }
  0xbd   : > { %364 = vst [vmem:[#allocation2 + $0x40] sm:$0xff] (!%p2104_p1), %v3006_v0  ;;  %365 = vst [vmem:[#allocation2 + $0x48] sm:$0xff] (!%p2104_p1), %v3006_v0 }
  0xbe   : > { %366 = vst [vmem:[#allocation2 + $0x50] sm:$0xff] (!%p2104_p1), %v3006_v0  ;;  %367 = vst [vmem:[#allocation2 + $0x58] sm:$0xff] (!%p2104_p1), %v3006_v0 }
  0xbf   : > { %368 = vst [vmem:[#allocation2 + $0x60] sm:$0xff] (!%p2104_p1), %v3006_v0  ;;  %369 = vst [vmem:[#allocation2 + $0x68] sm:$0xff] (!%p2104_p1), %v3006_v0 }
  0xc0   : > { %370 = vst [vmem:[#allocation2 + $0x70] sm:$0xff] %v3006_v0  ;;  %371 = vst [vmem:[#allocation2 + $0x78] sm:$0xff] %v3006_v0 }
  0xc1   : > { %372 = vst [vmem:[#allocation2 + $0x80] sm:$0xff] %v3006_v0  ;;  %373 = vst [vmem:[#allocation2 + $0x88] sm:$0xff] %v3006_v0 }
  0xc2   : > { %374 = vst [vmem:[#allocation2 + $0x90] sm:$0xff] %v3006_v0  ;;  %375 = vst [vmem:[#allocation2 + $0x98] sm:$0xff] %v3006_v0 }
  0xc3   : > { %376 = vst [vmem:[#allocation2 + $0xa0] sm:$0xff] %v3006_v0  ;;  %377 = vst [vmem:[#allocation2 + $0xa8] sm:$0xff] %v3006_v0 }
  0xc4   : > { %378 = vst [vmem:[#allocation2 + $0xb0] sm:$0xff] %v3006_v0  ;;  %379 = vst [vmem:[#allocation2 + $0xb8] sm:$0xff] %v3006_v0 }
  0xc5   : > { %380 = vst [vmem:[#allocation2 + $0xc0] sm:$0xff] %v3006_v0  ;;  %381 = vst [vmem:[#allocation2 + $0xc8] sm:$0xff] %v3006_v0 }
  0xc6   : > { %382 = vst [vmem:[#allocation2 + $0xd0] sm:$0xff] %v3006_v0  ;;  %383 = vst [vmem:[#allocation2 + $0xd8] sm:$0xff] %v3006_v0 }
  0xc7   : > { %384 = vst [vmem:[#allocation2 + $0xe0] sm:$0xff] %v3006_v0  ;;  %385 = vst [vmem:[#allocation2 + $0xe8] sm:$0xff] %v3006_v0 }
  0xc8   : > { %386 = vst [vmem:[#allocation2 + $0xf0] sm:$0xff] %v3006_v0  ;;  %387 = vst [vmem:[#allocation2 + $0xf8] sm:$0xff] %v3006_v0 }
  0xc9 PF: > { %v2451_v1 = vld [vmem:[%s3363_s21 + $0x4] ss:$8 sps:$4 sm:$0xff]   ;;  %v2453_v2 = vld [vmem:[%s3363_s21] ss:$8 sps:$4 sm:$0xff]   ;;  %v2454_v3 = vld [vmem:[%s3363_s21 + $0x14] ss:$8 sps:$4 sm:$0xff]  }
  0xca   : > { %676 = vmatprep.subr.bf16.mxu0 %v2451_v1  ;;  %v2456_v4 = vld [vmem:[%s3363_s21 + $0x10] ss:$8 sps:$4 sm:$0xff]   ;;  %v2457_v5 = vld [vmem:[%s3363_s21 + $0x24] ss:$8 sps:$4 sm:$0xff]   ;;  %v2459_v6 = vld [vmem:[%s3363_s21 + $0x20] ss:$8 sps:$4 sm:$0xff]  }
  0xcb   : > { %677 = vmatpush1.bf16.msra.mxu0 %v2453_v2  ;;  %v2460_v7 = vld [vmem:[%s3363_s21 + $0x34] ss:$8 sps:$4 sm:$0xff]   ;;  %v2472_v8 = vld [vmem:[%s3369_s10 + $0x4] ss:$8 sps:$4 sm:$0xff]   ;;  %v2474_v9 = vld [vmem:[%s3369_s10] ss:$8 sps:$4 sm:$0xff]  }
  0xcc   : > { %678 = vmatprep.subr.bf16.mxu0 %v2454_v3  ;;  %v2462_v10 = vld [vmem:[%s3363_s21 + $0x30] ss:$8 sps:$4 sm:$0xff]   ;;  %v2463_v11 = vld [vmem:[%s3363_s21 + $0x44] ss:$8 sps:$4 sm:$0xff]   ;;  %981 = vmatprep.subr.bf16.mxu1 %v2472_v8  ;;  %v2478_v12 = vld [vmem:[%s3369_s10 + $0x14] ss:$8 sps:$4 sm:$0xff]  }
  0xcd   : > { %982 = vmatpush1.bf16.msra.mxu1 %v2474_v9  ;;  %v2480_v13 = vld [vmem:[%s3369_s10 + $0x10] ss:$8 sps:$4 sm:$0xff]   ;;  %v2465_v14 = vld [vmem:[%s3363_s21 + $0x40] ss:$8 sps:$4 sm:$0xff]   ;;  %v2484_v15 = vld [vmem:[%s3369_s10 + $0x24] ss:$8 sps:$4 sm:$0xff]  }
  0xce   : > { %983 = vmatprep.subr.bf16.mxu1 %v2478_v12  ;;  %v2466_v16 = vld [vmem:[%s3363_s21 + $0x54] ss:$8 sps:$4 sm:$0xff]   ;;  %v2486_v17 = vld [vmem:[%s3369_s10 + $0x20] ss:$8 sps:$4 sm:$0xff]   ;;  %v2468_v19 = vld [vmem:[%s3363_s21 + $0x50] ss:$8 sps:$4 sm:$0xff]  }
  0xcf   : > { %679 = vmatpush1.bf16.msra.mxu0 %v2456_v4  ;;  %v2490_v18 = vld [vmem:[%s3369_s10 + $0x34] ss:$8 sps:$4 sm:$0xff]   ;;  %v2469_v20 = vld [vmem:[%s3363_s21 + $0x64] ss:$8 sps:$4 sm:$0xff]   ;;  %v2492_v21 = vld [vmem:[%s3369_s10 + $0x30] ss:$8 sps:$4 sm:$0xff]  }
  0xd0   : > { %680 = vmatprep.subr.bf16.mxu0 %v2457_v5  ;;  %v2496_v22 = vld [vmem:[%s3369_s10 + $0x44] ss:$8 sps:$4 sm:$0xff]   ;;  %v2471_v23 = vld [vmem:[%s3363_s21 + $0x60] ss:$8 sps:$4 sm:$0xff]   ;;  %v2475_v24 = vld [vmem:[%s3363_s21 + $0x74] ss:$8 sps:$4 sm:$0xff]  }
  0xd1   : > { %984 = vmatpush1.bf16.msra.mxu1 %v2480_v13  ;;  %v2498_v25 = vld [vmem:[%s3369_s10 + $0x40] ss:$8 sps:$4 sm:$0xff]   ;;  %v2502_v26 = vld [vmem:[%s3369_s10 + $0x54] ss:$8 sps:$4 sm:$0xff]   ;;  %v2477_v27 = vld [vmem:[%s3363_s21 + $0x70] ss:$8 sps:$4 sm:$0xff]  }
  0xd2   : > { %985 = vmatprep.subr.bf16.mxu1 %v2484_v15  ;;  %v2481_v28 = vld [vmem:[%s3363_s21 + $0x84] ss:$8 sps:$4 sm:$0xff]   ;;  %v2504_v29 = vld [vmem:[%s3369_s10 + $0x50] ss:$8 sps:$4 sm:$0xff]   ;;  %v2483_v31 = vld [vmem:[%s3363_s21 + $0x80] ss:$8 sps:$4 sm:$0xff]  }
  0xd3   : > { %681 = vmatpush1.bf16.msra.mxu0 %v2459_v6  ;;  %v2508_v30 = vld [vmem:[%s3369_s10 + $0x64] ss:$8 sps:$4 sm:$0xff]   ;;  %v2487_v32 = vld [vmem:[%s3363_s21 + $0x94] ss:$8 sps:$4 sm:$0xff]   ;;  %v2510_v33 = vld [vmem:[%s3369_s10 + $0x60] ss:$8 sps:$4 sm:$0xff]  }
  0xd4   : > { %682 = vmatprep.subr.bf16.mxu0 %v2460_v7  ;;  %v2514_v34 = vld [vmem:[%s3369_s10 + $0x74] ss:$8 sps:$4 sm:$0xff]   ;;  %v2489_v35 = vld [vmem:[%s3363_s21 + $0x90] ss:$8 sps:$4 sm:$0xff]   ;;  %v2531_v36 = vld [vmem:[%s3355_s9 + $0x4] ss:$8 sps:$4 sm:$0xff]  }
  0xd5   : > { %986 = vmatpush1.bf16.msra.mxu1 %v2486_v17  ;;  %v2493_v37 = vld [vmem:[%s3363_s21 + $0xa4] ss:$8 sps:$4 sm:$0xff]   ;;  %v2516_v38 = vld [vmem:[%s3369_s10 + $0x70] ss:$8 sps:$4 sm:$0xff]   ;;  %708 = vmatprep.mubr.bf16.mxu0 %v2531_v36  ;;  %v2495_v40 = vld [vmem:[%s3363_s21 + $0xa0] ss:$8 sps:$4 sm:$0xff]  }
  0xd6   : > { %987 = vmatprep.subr.bf16.mxu1 %v2490_v18  ;;  %v2520_v39 = vld [vmem:[%s3369_s10 + $0x84] ss:$8 sps:$4 sm:$0xff]   ;;  %1013 = vmatprep.mubr.bf16.mxu1 %v2531_v36  ;;  %v2499_v41 = vld [vmem:[%s3363_s21 + $0xb4] ss:$8 sps:$4 sm:$0xff]   ;;  %v2522_v42 = vld [vmem:[%s3369_s10 + $0x80] ss:$8 sps:$4 sm:$0xff]  }
  0xd7   : > { %683 = vmatpush1.bf16.msra.mxu0 %v2462_v10  ;;  %v2526_v43 = vld [vmem:[%s3369_s10 + $0x94] ss:$8 sps:$4 sm:$0xff]   ;;  %v2501_v44 = vld [vmem:[%s3363_s21 + $0xb0] ss:$8 sps:$4 sm:$0xff]   ;;  %v2505_v45 = vld [vmem:[%s3363_s21 + $0xc4] ss:$8 sps:$4 sm:$0xff]  }
  0xd8   : > { %684 = vmatprep.subr.bf16.mxu0 %v2463_v11  ;;  %v2528_v46 = vld [vmem:[%s3369_s10 + $0x90] ss:$8 sps:$4 sm:$0xff]   ;;  %v2532_v47 = vld [vmem:[%s3369_s10 + $0xa4] ss:$8 sps:$4 sm:$0xff]   ;;  %v2507_v48 = vld [vmem:[%s3363_s21 + $0xc0] ss:$8 sps:$4 sm:$0xff]  }
  0xd9   : > { %988 = vmatpush1.bf16.msra.mxu1 %v2492_v21  ;;  %v2511_v49 = vld [vmem:[%s3363_s21 + $0xd4] ss:$8 sps:$4 sm:$0xff]   ;;  %v2534_v50 = vld [vmem:[%s3369_s10 + $0xa0] ss:$8 sps:$4 sm:$0xff]   ;;  %v2513_v52 = vld [vmem:[%s3363_s21 + $0xd0] ss:$8 sps:$4 sm:$0xff]  }
  0xda   : > { %989 = vmatprep.subr.bf16.mxu1 %v2496_v22  ;;  %v2535_v51 = vld [vmem:[%s3369_s10 + $0xb4] ss:$8 sps:$4 sm:$0xff]   ;;  %v2517_v53 = vld [vmem:[%s3363_s21 + $0xe4] ss:$8 sps:$4 sm:$0xff]   ;;  %v2537_v54 = vld [vmem:[%s3369_s10 + $0xb0] ss:$8 sps:$4 sm:$0xff]  }
  0xdb   : > { %685 = vmatpush1.bf16.msra.mxu0 %v2465_v14  ;;  %v2541_v55 = vld [vmem:[%s3369_s10 + $0xc4] ss:$8 sps:$4 sm:$0xff]   ;;  %v2519_v56 = vld [vmem:[%s3363_s21 + $0xe0] ss:$8 sps:$4 sm:$0xff]   ;;  %v2523_v57 = vld [vmem:[%s3363_s21 + $0xf4] ss:$8 sps:$4 sm:$0xff]  }
  0xdc   : > { %686 = vmatprep.subr.bf16.mxu0 %v2466_v16  ;;  %v2543_v58 = vld [vmem:[%s3369_s10 + $0xc0] ss:$8 sps:$4 sm:$0xff]   ;;  %v2544_v59 = vld [vmem:[%s3369_s10 + $0xd4] ss:$8 sps:$4 sm:$0xff]   ;;  %v2525_v60 = vld [vmem:[%s3363_s21 + $0xf0] ss:$8 sps:$4 sm:$0xff]  }
  0xdd   : > { %990 = vmatpush1.bf16.msra.mxu1 %v2498_v25  ;;  %v2546_v61 = vld [vmem:[%s3369_s10 + $0xd0] ss:$8 sps:$4 sm:$0xff]   ;;  %v2529_v62 = vld [vmem:[%s3355_s9] ss:$8 sps:$4 sm:$0xff]   ;;  %v2573_v63 = vld [vmem:[%s3371_s27 + $0x4] ss:$8 sps:$4 sm:$0xff]  }
  0xde   : > { %991 = vmatprep.subr.bf16.mxu1 %v2502_v26  ;;  %v2538_v0 = vld [vmem:[%s3355_s9 + $0x14] ss:$8 sps:$4 sm:$0xff]   ;;  %v2550_v1 = vld [vmem:[%s3369_s10 + $0xe4] ss:$8 sps:$4 sm:$0xff]   ;;  %v2571_v2 = vld [vmem:[%s3371_s27] ss:$8 sps:$4 sm:$0xff]  }
  0xdf   : > { %687 = vmatpush1.bf16.msra.mxu0 %v2468_v19  ;;  %v2576_v3 = vld [vmem:[%s3371_s27 + $0x14] ss:$8 sps:$4 sm:$0xff]   ;;  %v2552_v4 = vld [vmem:[%s3369_s10 + $0xe0] ss:$8 sps:$4 sm:$0xff]   ;;  %v2574_v6 = vld [vmem:[%s3371_s27 + $0x10] ss:$8 sps:$4 sm:$0xff]  }
  0xe0   : > { %688 = vmatprep.subr.bf16.mxu0 %v2469_v20  ;;  %v2553_v5 = vld [vmem:[%s3369_s10 + $0xf4] ss:$8 sps:$4 sm:$0xff]   ;;  %v2579_v7 = vld [vmem:[%s3371_s27 + $0x24] ss:$8 sps:$4 sm:$0xff]   ;;  %v2555_v8 = vld [vmem:[%s3369_s10 + $0xf0] ss:$8 sps:$4 sm:$0xff]  }
  0xe1   : > { %992 = vmatpush1.bf16.msra.mxu1 %v2504_v29  ;;  %v2540_v9 = vld [vmem:[%s3355_s9 + $0x10] ss:$8 sps:$4 sm:$0xff]   ;;  %v2547_v10 = vld [vmem:[%s3355_s9 + $0x24] ss:$8 sps:$4 sm:$0xff]   ;;  %v2577_v11 = vld [vmem:[%s3371_s27 + $0x20] ss:$8 sps:$4 sm:$0xff]  }
  0xe2   : > { %993 = vmatprep.subr.bf16.mxu1 %v2508_v30  ;;  %v2582_v12 = vld [vmem:[%s3371_s27 + $0x34] ss:$8 sps:$4 sm:$0xff]   ;;  %v2580_v13 = vld [vmem:[%s3371_s27 + $0x30] ss:$8 sps:$4 sm:$0xff]   ;;  %v2585_v14 = vld [vmem:[%s3371_s27 + $0x44] ss:$8 sps:$4 sm:$0xff]  }
  0xe3   : > { %689 = vmatpush1.bf16.msra.mxu0 %v2471_v23  ;;  %v2549_v15 = vld [vmem:[%s3355_s9 + $0x20] ss:$8 sps:$4 sm:$0xff]   ;;  %v2556_v16 = vld [vmem:[%s3355_s9 + $0x34] ss:$8 sps:$4 sm:$0xff]   ;;  %v2586_v19 = vld [vmem:[%s3371_s27 + $0x50] ss:$8 sps:$4 sm:$0xff]  }
  0xe4   : > { %690 = vmatprep.subr.bf16.mxu0 %v2475_v24  ;;  %v2583_v17 = vld [vmem:[%s3371_s27 + $0x40] ss:$8 sps:$4 sm:$0xff]   ;;  %v2588_v18 = vld [vmem:[%s3371_s27 + $0x54] ss:$8 sps:$4 sm:$0xff]   ;;  %v2591_v20 = vld [vmem:[%s3371_s27 + $0x64] ss:$8 sps:$4 sm:$0xff]  }
  0xe5   : > { %994 = vmatpush1.bf16.msra.mxu1 %v2510_v33  ;;  %v2558_v21 = vld [vmem:[%s3355_s9 + $0x30] ss:$8 sps:$4 sm:$0xff]   ;;  %v2559_v22 = vld [vmem:[%s3355_s9 + $0x44] ss:$8 sps:$4 sm:$0xff]   ;;  %v2589_v23 = vld [vmem:[%s3371_s27 + $0x60] ss:$8 sps:$4 sm:$0xff]  }
  0xe6   : > { %995 = vmatprep.subr.bf16.mxu1 %v2514_v34  ;;  %v2561_v24 = vld [vmem:[%s3355_s9 + $0x40] ss:$8 sps:$4 sm:$0xff]   ;;  %v2562_v25 = vld [vmem:[%s3355_s9 + $0x54] ss:$8 sps:$4 sm:$0xff]   ;;  %v2564_v26 = vld [vmem:[%s3355_s9 + $0x50] ss:$8 sps:$4 sm:$0xff]  }
  0xe7   : > { %691 = vmatpush1.bf16.msra.mxu0 %v2477_v27  ;;  %v2565_v27 = vld [vmem:[%s3355_s9 + $0x64] ss:$8 sps:$4 sm:$0xff]   ;;  %v2568_v29 = vld [vmem:[%s3355_s9 + $0x74] ss:$8 sps:$4 sm:$0xff]   ;;  %v2570_v30 = vld [vmem:[%s3355_s9 + $0x70] ss:$8 sps:$4 sm:$0xff]  }
  0xe8   : > { %692 = vmatprep.subr.bf16.mxu0 %v2481_v28  ;;  %v2567_v28 = vld [vmem:[%s3355_s9 + $0x60] ss:$8 sps:$4 sm:$0xff]   ;;  %v2597_v33 = vld [vmem:[%s3371_s27 + $0x84] ss:$8 sps:$4 sm:$0xff]   ;;  %v2598_v36 = vld [vmem:[%s3371_s27 + $0x90] ss:$8 sps:$4 sm:$0xff]  }
  0xe9   : > { %996 = vmatpush1.bf16.msra.mxu1 %v2516_v38  ;;  %v2595_v34 = vld [vmem:[%s3371_s27 + $0x80] ss:$8 sps:$4 sm:$0xff]   ;;  %s3862_s11 = sld [smem:[#allocation18_spill]] }
  0xea   : > { %997 = vmatprep.subr.bf16.mxu1 %v2520_v39  ;;  %v2601_v38 = vld [vmem:[%s3371_s27 + $0xa0] ss:$8 sps:$4 sm:$0xff]   ;;  %v2606_v39 = vld [vmem:[%s3371_s27 + $0xb4] ss:$8 sps:$4 sm:$0xff]  }
  0xeb   : > { %693 = vmatpush1.bf16.msra.mxu0 %v2483_v31  ;;  %v2594_v31 = vld [vmem:[%s3371_s27 + $0x74] ss:$8 sps:$4 sm:$0xff]  }
  0xec   : > { %694 = vmatprep.subr.bf16.mxu0 %v2487_v32  ;;  %v2592_v32 = vld [vmem:[%s3371_s27 + $0x70] ss:$8 sps:$4 sm:$0xff]  }
  0xed   : > { %998 = vmatpush1.bf16.msra.mxu1 %v2522_v42  ;;  %v2607_v42 = vld [vmem:[%s3371_s27 + $0xc0] ss:$8 sps:$4 sm:$0xff]  }
  0xee   : > { %999 = vmatprep.subr.bf16.mxu1 %v2526_v43  ;;  %v2612_v43 = vld [vmem:[%s3371_s27 + $0xd4] ss:$8 sps:$4 sm:$0xff]  }
  0xef   : > { %695 = vmatpush1.bf16.msra.mxu0 %v2489_v35  ;;  %v2600_v35 = vld [vmem:[%s3371_s27 + $0x94] ss:$8 sps:$4 sm:$0xff]   ;;  %p2249_p5 = scmp.ne.s32.totalorder %s3862_s11, 1 }
  0xf0   : > { %696 = vmatprep.subr.bf16.mxu0 %v2493_v37  ;;  %v2603_v37 = vld [vmem:[%s3371_s27 + $0xa4] ss:$8 sps:$4 sm:$0xff]  }
  0xf1   : > { %1000 = vmatpush1.bf16.msra.mxu1 %v2528_v46  ;;  %v2613_v46 = vld [vmem:[%s3371_s27 + $0xe0] ss:$8 sps:$4 sm:$0xff]  }
  0xf2   : > { %1001 = vmatprep.subr.bf16.mxu1 %v2532_v47  ;;  %v2618_v47 = vld [vmem:[%s3371_s27 + $0xf4] ss:$8 sps:$4 sm:$0xff]  }
  0xf3   : > { %697 = vmatpush1.bf16.msra.mxu0 %v2495_v40  ;;  %v2604_v40 = vld [vmem:[%s3371_s27 + $0xb0] ss:$8 sps:$4 sm:$0xff]  }
  0xf4   : > { %698 = vmatprep.subr.bf16.mxu0 %v2499_v41  ;;  %v2609_v41 = vld [vmem:[%s3371_s27 + $0xc4] ss:$8 sps:$4 sm:$0xff]  }
  0xf5   : > { %1002 = vmatpush1.bf16.msra.mxu1 %v2534_v50 }
  0xf6   : > { %1003 = vmatprep.subr.bf16.mxu1 %v2535_v51 }
  0xf7   : > { %699 = vmatpush1.bf16.msra.mxu0 %v2501_v44  ;;  %v2610_v44 = vld [vmem:[%s3371_s27 + $0xd0] ss:$8 sps:$4 sm:$0xff]  }
  0xf8   : > { %700 = vmatprep.subr.bf16.mxu0 %v2505_v45  ;;  %v2615_v45 = vld [vmem:[%s3371_s27 + $0xe4] ss:$8 sps:$4 sm:$0xff]  }
  0xf9   : > { %1004 = vmatpush1.bf16.msra.mxu1 %v2537_v54 }
  0xfa   : > { %1005 = vmatprep.subr.bf16.mxu1 %v2541_v55 }
  0xfb   : > { %701 = vmatpush1.bf16.msra.mxu0 %v2507_v48  ;;  %v2616_v48 = vld [vmem:[%s3371_s27 + $0xf0] ss:$8 sps:$4 sm:$0xff]  }
  0xfc   : > { %702 = vmatprep.subr.bf16.mxu0 %v2511_v49 }
  0xfd   : > { %1006 = vmatpush1.bf16.msra.mxu1 %v2543_v58 }
  0xfe   : > { %1007 = vmatprep.subr.bf16.mxu1 %v2544_v59 }
  0xff   : > { %703 = vmatpush1.bf16.msra.mxu0 %v2513_v52 }
 0x100   : > { %704 = vmatprep.subr.bf16.mxu0 %v2517_v53 }
 0x101   : > { %1008 = vmatpush1.bf16.msra.mxu1 %v2546_v61 }
 0x102   : > { %1009 = vmatprep.subr.bf16.mxu1 %v2550_v1 }
 0x103   : > { %705 = vmatpush1.bf16.msra.mxu0 %v2519_v56 }
 0x104   : > { %706 = vmatprep.subr.bf16.mxu0 %v2523_v57 }
 0x105   : > { %1010 = vmatpush1.bf16.msra.mxu1 %v2552_v4 }
 0x106   : > { %1011 = vmatprep.subr.bf16.mxu1 %v2553_v5 }
 0x107   : > { %707 = vmatpush1.bf16.msra.mxu0 %v2525_v60 }
 0x108   : > { %1590 = vmatprep.subr.bf16.mxu0 %v2573_v63 }
 0x109   : > { %1012 = vmatpush1.bf16.msra.mxu1 %v2555_v8 }
 0x10a   : > { %709 = vmatmul.mubr.bf16.vlgmr.msra.gmra.mrb[0].mxu0 %v2529_v62  ;;  %2296 = vmatprep.subr.bf16.mxu1 %v2573_v63 }
 0x10b   : > { %718 = vmatprep.mubr.bf16.mxu0 %v2538_v0  ;;  %1591 = vmatpush1.bf16.msra.mxu0 %v2571_v2 }
 0x10c   : > { %1592 = vmatprep.subr.bf16.mxu0 %v2576_v3  ;;  %1014 = vmatmul.mubr.bf16.vlgmr.msra.gmra.mrb[0].mxu1 %v2529_v62 }
 0x10d   : > { %1023 = vmatprep.mubr.bf16.mxu1 %v2538_v0  ;;  %2312 = vmatpush1.bf16.msra.mxu1 %v2571_v2 }
 0x10e   : > { %2297 = vmatprep.subr.bf16.mxu1 %v2576_v3 }
 0x10f   : > { %1593 = vmatpush1.bf16.msra.mxu0 %v2574_v6 }
 0x110   : > { %1594 = vmatprep.subr.bf16.mxu0 %v2579_v7 }
 0x111   : > { %2313 = vmatpush1.bf16.msra.mxu1 %v2574_v6 }
 0x112   : > { %719 = vmatmul.mubr.bf16.gmra.mrb[4].mxu0 %v2540_v9  ;;  %2298 = vmatprep.subr.bf16.mxu1 %v2579_v7 }
 0x113   : > { %728 = vmatprep.mubr.bf16.mxu0 %v2547_v10  ;;  %1595 = vmatpush1.bf16.msra.mxu0 %v2577_v11 }
 0x114   : > { %1596 = vmatprep.subr.bf16.mxu0 %v2582_v12  ;;  %1024 = vmatmul.mubr.bf16.gmra.mrb[4].mxu1 %v2540_v9 }
 0x115   : > { %1033 = vmatprep.mubr.bf16.mxu1 %v2547_v10  ;;  %2314 = vmatpush1.bf16.msra.mxu1 %v2577_v11 }
 0x116   : > { %2299 = vmatprep.subr.bf16.mxu1 %v2582_v12 }
 0x117   : > { %1597 = vmatpush1.bf16.msra.mxu0 %v2580_v13 }
 0x118   : > { %1598 = vmatprep.subr.bf16.mxu0 %v2585_v14 }
 0x119   : > { %2315 = vmatpush1.bf16.msra.mxu1 %v2580_v13 }
 0x11a   : > { %729 = vmatmul.mubr.bf16.gmra.mrb[8].mxu0 %v2549_v15  ;;  %2300 = vmatprep.subr.bf16.mxu1 %v2585_v14 }
 0x11b   : > { %738 = vmatprep.mubr.bf16.mxu0 %v2556_v16  ;;  %1599 = vmatpush1.bf16.msra.mxu0 %v2583_v17 }
 0x11c   : > { %1600 = vmatprep.subr.bf16.mxu0 %v2588_v18  ;;  %1034 = vmatmul.mubr.bf16.gmra.mrb[8].mxu1 %v2549_v15 }
 0x11d   : > { %1043 = vmatprep.mubr.bf16.mxu1 %v2556_v16  ;;  %2316 = vmatpush1.bf16.msra.mxu1 %v2583_v17 }
 0x11e   : > { %2301 = vmatprep.subr.bf16.mxu1 %v2588_v18 }
 0x11f   : > { %1601 = vmatpush1.bf16.msra.mxu0 %v2586_v19 }
 0x120   : > { %1602 = vmatprep.subr.bf16.mxu0 %v2591_v20 }
 0x121   : > { %2317 = vmatpush1.bf16.msra.mxu1 %v2586_v19 }
 0x122   : > { %739 = vmatmul.mubr.bf16.gmra.mrb[12].mxu0 %v2558_v21  ;;  %2302 = vmatprep.subr.bf16.mxu1 %v2591_v20 }
 0x123   : > { %748 = vmatprep.mubr.bf16.mxu0 %v2559_v22  ;;  %1603 = vmatpush1.bf16.msra.mxu0 %v2589_v23 }
 0x124   : > { %1044 = vmatmul.mubr.bf16.gmra.mrb[12].mxu1 %v2558_v21  ;;  %1604 = vmatprep.subr.bf16.mxu0 %v2594_v31 }
 0x125   : > { %1053 = vmatprep.mubr.bf16.mxu1 %v2559_v22  ;;  %2318 = vmatpush1.bf16.msra.mxu1 %v2589_v23 }
 0x126   : > { %2303 = vmatprep.subr.bf16.mxu1 %v2594_v31 }
 0x127   : > { %1605 = vmatpush1.bf16.msra.mxu0 %v2592_v32 }
 0x128   : > { %1606 = vmatprep.subr.bf16.mxu0 %v2597_v33 }
 0x129   : > { %2319 = vmatpush1.bf16.msra.mxu1 %v2592_v32 }
 0x12a   : > { %749 = vmatmul.mubr.bf16.gmra.mrb[16].mxu0 %v2561_v24  ;;  %2304 = vmatprep.subr.bf16.mxu1 %v2597_v33 }
 0x12b   : > { %758 = vmatprep.mubr.bf16.mxu0 %v2562_v25  ;;  %1607 = vmatpush1.bf16.msra.mxu0 %v2595_v34 }
 0x12c   : > { %1054 = vmatmul.mubr.bf16.gmra.mrb[16].mxu1 %v2561_v24  ;;  %1608 = vmatprep.subr.bf16.mxu0 %v2600_v35 }
 0x12d   : > { %1063 = vmatprep.mubr.bf16.mxu1 %v2562_v25  ;;  %2320 = vmatpush1.bf16.msra.mxu1 %v2595_v34 }
 0x12e   : > { %2305 = vmatprep.subr.bf16.mxu1 %v2600_v35 }
 0x12f   : > { %1609 = vmatpush1.bf16.msra.mxu0 %v2598_v36 }
 0x130   : > { %1610 = vmatprep.subr.bf16.mxu0 %v2603_v37 }
 0x131   : > { %2321 = vmatpush1.bf16.msra.mxu1 %v2598_v36 }
 0x132   : > { %759 = vmatmul.mubr.bf16.gmra.mrb[20].mxu0 %v2564_v26  ;;  %2306 = vmatprep.subr.bf16.mxu1 %v2603_v37 }
 0x133   : > { %768 = vmatprep.mubr.bf16.mxu0 %v2565_v27  ;;  %1611 = vmatpush1.bf16.msra.mxu0 %v2601_v38 }
 0x134   : > { %1064 = vmatmul.mubr.bf16.gmra.mrb[20].mxu1 %v2564_v26  ;;  %1612 = vmatprep.subr.bf16.mxu0 %v2606_v39 }
 0x135   : > { %1073 = vmatprep.mubr.bf16.mxu1 %v2565_v27  ;;  %2322 = vmatpush1.bf16.msra.mxu1 %v2601_v38 }
 0x136   : > { %2307 = vmatprep.subr.bf16.mxu1 %v2606_v39 }
 0x137   : > { %1613 = vmatpush1.bf16.msra.mxu0 %v2604_v40 }
 0x138   : > { %1614 = vmatprep.subr.bf16.mxu0 %v2609_v41 }
 0x139   : > { %2323 = vmatpush1.bf16.msra.mxu1 %v2604_v40 }
 0x13a   : > { %769 = vmatmul.mubr.bf16.gmra.mrb[24].mxu0 %v2567_v28  ;;  %2308 = vmatprep.subr.bf16.mxu1 %v2609_v41 }
 0x13b   : > { %778 = vmatprep.mubr.bf16.mxu0 %v2568_v29  ;;  %1615 = vmatpush1.bf16.msra.mxu0 %v2607_v42 }
 0x13c   : > { %1074 = vmatmul.mubr.bf16.gmra.mrb[24].mxu1 %v2567_v28  ;;  %1616 = vmatprep.subr.bf16.mxu0 %v2612_v43 }
 0x13d   : > { %1083 = vmatprep.mubr.bf16.mxu1 %v2568_v29  ;;  %2324 = vmatpush1.bf16.msra.mxu1 %v2607_v42 }
 0x13e   : > { %2309 = vmatprep.subr.bf16.mxu1 %v2612_v43 }
 0x13f   : > { %1617 = vmatpush1.bf16.msra.mxu0 %v2610_v44 }
 0x140   : > { %1618 = vmatprep.subr.bf16.mxu0 %v2615_v45 }
 0x141   : > { %2325 = vmatpush1.bf16.msra.mxu1 %v2610_v44 }
 0x142   : > { %779 = vmatmul.mubr.bf16.gmra.mrb[28].mxu0 %v2570_v30  ;;  %2310 = vmatprep.subr.bf16.mxu1 %v2615_v45 }
 0x143   : > { %1619 = vmatpush1.bf16.msra.mxu0 %v2613_v46 }
 0x144   : > { %1084 = vmatmul.mubr.bf16.gmra.mrb[28].mxu1 %v2570_v30  ;;  %1620 = vmatprep.subr.bf16.mxu0 %v2618_v47 }
 0x145   : > { %2326 = vmatpush1.bf16.msra.mxu1 %v2613_v46 }
 0x146   : > { %2311 = vmatprep.subr.bf16.mxu1 %v2618_v47 }
 0x147   : > { %1621 = vmatpush1.bf16.msra.mxu0 %v2616_v48 }
 0x149   : > { %2327 = vmatpush1.bf16.msra.mxu1 %v2616_v48 }
 0x1dd   : > { %v3492_v49 = vpop.f32.mrb[0].mxu0 }
 0x1de   : > { %v2185_v50 = vmul.f32 -1.442695, %v3492_v49  ;;  %v3495_v51 = vpop.f32.mrb[1].mxu0 }
 0x1df   : > { %v2186_v52 = vmul.f32 -1.442695, %v3495_v51  ;;  %v3498_v53 = vpop.f32.mrb[2].mxu0  ;;  %v3512_v62 = vpop.f32.mrb[0].mxu1 }
 0x1e0   : > { %2619 = vpow2.f32 %v2185_v50  ;;  %v2187_v54 = vmul.f32 -1.442695, %v3498_v53  ;;  %v3501_v55 = vpop.f32.mrb[3].mxu0  ;;  %v3517_v1 = vpop.f32.mrb[1].mxu1 }
 0x1e1   : > { %2621 = vpow2.f32 %v2186_v52  ;;  %v2188_v56 = vmul.f32 -1.442695, %v3501_v55  ;;  %v3520_v3 = vpop.f32.mrb[2].mxu1 }
 0x1e2   : > { %2623 = vpow2.f32 %v2187_v54  ;;  %v3522_v5 = vpop.f32.mrb[3].mxu1 }
 0x1e3   : > { %2625 = vpow2.f32 %v2188_v56 }
 0x1e5   : > { %v3504_v57 = vpop.f32.mrb[4].mxu0 }
 0x1e6   : > { %v2189_v58 = vmul.f32 -1.442695, %v3504_v57  ;;  %v3507_v59 = vpop.f32.mrb[5].mxu0 }
 0x1e7   : > { %v2190_v60 = vmul.f32 -1.442695, %v3507_v59  ;;  %v3510_v61 = vpop.f32.mrb[6].mxu0  ;;  %v3532_v18 = vpop.f32.mrb[4].mxu1 }
 0x1e8   : > { %2627 = vpow2.f32 %v2189_v58  ;;  %v2191_v63 = vmul.f32 -1.442695, %v3510_v61  ;;  %v3515_v0 = vpop.f32.mrb[7].mxu0  ;;  %v3537_v21 = vpop.f32.mrb[5].mxu1 }
 0x1e9   : > { %2629 = vpow2.f32 %v2190_v60  ;;  %v2192_v2 = vmul.f32 -1.442695, %v3515_v0  ;;  %v3540_v23 = vpop.f32.mrb[6].mxu1 }
 0x1ea   : > { %v2620_v4 = vpop.eup %2619  ;;  %2631 = vpow2.f32 %v2191_v63  ;;  %v3542_v25 = vpop.f32.mrb[7].mxu1 }
 0x1eb   : > { %v2622_v6 = vpop.eup %2621  ;;  %v1190_v7 = vadd.f32 1.0, %v2620_v4  ;;  %2633 = vpow2.f32 %v2192_v2 }
 0x1ec   : > { %v2624_v8 = vpop.eup %2623  ;;  %v1191_v9 = vadd.f32 1.0, %v2622_v6 }
 0x1ed   : > { %v2626_v10 = vpop.eup %2625  ;;  %2635 = vrcp.f32 %v1190_v7  ;;  %v1192_v11 = vadd.f32 1.0, %v2624_v8  ;;  %v3524_v12 = vpop.f32.mrb[8].mxu0 }
 0x1ee   : > { %2637 = vrcp.f32 %v1191_v9  ;;  %v1193_v13 = vadd.f32 1.0, %v2626_v10  ;;  %v2193_v14 = vmul.f32 -1.442695, %v3524_v12  ;;  %v3527_v15 = vpop.f32.mrb[9].mxu0 }
 0x1ef   : > { %2639 = vrcp.f32 %v1192_v11  ;;  %v2194_v16 = vmul.f32 -1.442695, %v3527_v15  ;;  %v3530_v17 = vpop.f32.mrb[10].mxu0  ;;  %v3552_v39 = vpop.f32.mrb[8].mxu1 }
 0x1f0   : > { %2641 = vrcp.f32 %v1193_v13  ;;  %v2195_v19 = vmul.f32 -1.442695, %v3530_v17  ;;  %v3535_v20 = vpop.f32.mrb[11].mxu0  ;;  %v3558_v44 = vpop.f32.mrb[9].mxu1 }
 0x1f1   : > { %2643 = vpow2.f32 %v2193_v14  ;;  %v2196_v22 = vmul.f32 -1.442695, %v3535_v20  ;;  %v3562_v48 = vpop.f32.mrb[10].mxu1 }
 0x1f2   : > { %v2628_v24 = vpop.eup %2627  ;;  %2645 = vpow2.f32 %v2194_v16  ;;  %v3566_v54 = vpop.f32.mrb[11].mxu1 }
 0x1f3   : > { %v2630_v26 = vpop.eup %2629  ;;  %v1194_v27 = vadd.f32 1.0, %v2628_v24  ;;  %2647 = vpow2.f32 %v2195_v19 }
 0x1f4   : > { %v2632_v28 = vpop.eup %2631  ;;  %v1195_v29 = vadd.f32 1.0, %v2630_v26  ;;  %2649 = vpow2.f32 %v2196_v22 }
 0x1f5   : > { %v2634_v30 = vpop.eup %2633  ;;  %2651 = vrcp.f32 %v1194_v27  ;;  %v1196_v31 = vadd.f32 1.0, %v2632_v28  ;;  %v3544_v32 = vpop.f32.mrb[12].mxu0 }
 0x1f6   : > { %2653 = vrcp.f32 %v1195_v29  ;;  %v1197_v33 = vadd.f32 1.0, %v2634_v30  ;;  %v2197_v34 = vmul.f32 -1.442695, %v3544_v32  ;;  %v3547_v35 = vpop.f32.mrb[13].mxu0 }
 0x1f7   : > { %v2636_v36 = vpop.eup %2635  ;;  %2655 = vrcp.f32 %v1196_v31  ;;  %v2198_v37 = vmul.f32 -1.442695, %v3547_v35  ;;  %v3550_v38 = vpop.f32.mrb[14].mxu0 }
 0x1f8   : > { %v2638_v40 = vpop.eup %2637  ;;  %v1286_v41 = vmul.f32 %v2636_v36, %v3492_v49  ;;  %2657 = vrcp.f32 %v1197_v33  ;;  %v2199_v42 = vmul.f32 -1.442695, %v3550_v38  ;;  %v3556_v43 = vpop.f32.mrb[15].mxu0 }
 0x1f9   : > { %v2640_v45 = vpop.eup %2639  ;;  %v1287_v46 = vmul.f32 %v2638_v40, %v3495_v51  ;;  %2659 = vpow2.f32 %v2197_v34  ;;  %v2200_v47 = vmul.f32 -1.442695, %v3556_v43  ;;  %v3580_v16 = vpop.f32.mrb[12].mxu1 }
 0x1fa   : > { %v2642_v50 = vpop.eup %2641  ;;  %v1288_v52 = vmul.f32 %v2640_v45, %v3498_v53  ;;  %2661 = vpow2.f32 %v2198_v37  ;;  %v1318_v49 = vmul.f32 %v1286_v41, %v3512_v62  ;;  %v3586_v26 = vpop.f32.mrb[13].mxu1 }
 0x1fb   : > { %v2644_v56 = vpop.eup %2643  ;;  %v1289_v58 = vmul.f32 %v2642_v50, %v3501_v55  ;;  %2663 = vpow2.f32 %v2199_v42  ;;  %v1319_v60 = vmul.f32 %v1287_v46, %v3517_v1  ;;  %v3590_v30 = vpop.f32.mrb[14].mxu1 }
 0x1fc   : > { %v2646_v51 = vpop.eup %2645  ;;  %v1198_v63 = vadd.f32 1.0, %v2644_v56  ;;  %2665 = vpow2.f32 %v2200_v47  ;;  %v1320_v2 = vmul.f32 %v1288_v52, %v3520_v3  ;;  %v3594_v34 = vpop.f32.mrb[15].mxu1 }
 0x1fd   : > { %v2648_v4 = vpop.eup %2647  ;;  %v1199_v6 = vadd.f32 1.0, %v2646_v51  ;;  %v1321_v53 = vmul.f32 %v1289_v58, %v3522_v5  ;;  %v3572_v7 = vpop.f32.mrb[16].mxu0 }
 0x1fe   : > { %v2650_v62 = vpop.eup %2649  ;;  %2667 = vrcp.f32 %v1198_v63  ;;  %v1200_v8 = vadd.f32 1.0, %v2648_v4  ;;  %v1350_v9 = vpack.c.bf16 %v1320_v2, %v1318_v49  ;;  %v2201_v55 = vmul.f32 -1.442695, %v3572_v7  ;;  %v3575_v10 = vpop.f32.mrb[17].mxu0 }
 0x1ff   : > { %v2652_v1 = vpop.eup %2651  ;;  %2669 = vrcp.f32 %v1199_v6  ;;  %v1201_v11 = vadd.f32 1.0, %v2650_v62  ;;  %v1351_v13 = vpack.c.bf16 %v1321_v53, %v1319_v60  ;;  %v2202_v3 = vmul.f32 -1.442695, %v3575_v10  ;;  %v3578_v14 = vpop.f32.mrb[18].mxu0 }
 0x200   : > { %v2654_v5 = vpop.eup %2653  ;;  %v1290_v19 = vmul.f32 %v2652_v1, %v3504_v57  ;;  %2671 = vrcp.f32 %v1200_v8  ;;  %v2203_v22 = vmul.f32 -1.442695, %v3578_v14  ;;  %v3584_v24 = vpop.f32.mrb[19].mxu0 }
 0x201   : > { %v2656_v27 = vpop.eup %2655  ;;  %v1291_v28 = vmul.f32 %v2654_v5, %v3507_v59  ;;  %2673 = vrcp.f32 %v1201_v11  ;;  %v2204_v29 = vmul.f32 -1.442695, %v3584_v24  ;;  %1622 = vmatprep.mubr.bf16.mxu0 %v1351_v13  ;;  %v3608_v60 = vpop.f32.mrb[16].mxu1 }
 0x202   : > { %v2658_v31 = vpop.eup %2657  ;;  %v1292_v33 = vmul.f32 %v2656_v27, %v3510_v61  ;;  %2675 = vpow2.f32 %v2201_v55  ;;  %v1322_v57 = vmul.f32 %v1290_v19, %v3532_v18  ;;  %1623 = vmatmul.mubr.bf16.vlgmr.msra.gmra.mrb[32].mxu0 %v1350_v9  ;;  %v3613_v2 = vpop.f32.mrb[17].mxu1 }
 0x203   : > { %v2660_v36 = vpop.eup %2659  ;;  %v1293_v37 = vmul.f32 %v2658_v31, %v3515_v0  ;;  %2677 = vpow2.f32 %v2202_v3  ;;  %v1323_v59 = vmul.f32 %v1291_v28, %v3537_v21  ;;  %v3617_v62 = vpop.f32.mrb[18].mxu1 }
 0x204   : > { %v2662_v40 = vpop.eup %2661  ;;  %v1202_v41 = vadd.f32 1.0, %v2660_v36  ;;  %2679 = vpow2.f32 %v2203_v22  ;;  %v1324_v42 = vmul.f32 %v1292_v33, %v3540_v23  ;;  %v3620_v55 = vpop.f32.mrb[19].mxu1 }
 0x205   : > { %v2664_v45 = vpop.eup %2663  ;;  %v1203_v46 = vadd.f32 1.0, %v2662_v40  ;;  %2681 = vpow2.f32 %v2204_v29  ;;  %v1325_v61 = vmul.f32 %v1293_v37, %v3542_v25  ;;  %v3600_v18 = vpop.f32.mrb[20].mxu0 }
 0x206   : > { %v2666_v47 = vpop.eup %2665  ;;  %2683 = vrcp.f32 %v1202_v41  ;;  %v1204_v50 = vadd.f32 1.0, %v2664_v45  ;;  %v1352_v52 = vpack.c.bf16 %v1324_v42, %v1322_v57  ;;  %v2205_v0 = vmul.f32 -1.442695, %v3600_v18  ;;  %v3603_v49 = vpop.f32.mrb[21].mxu0 }
 0x207   : > { %2685 = vrcp.f32 %v1203_v46  ;;  %v1205_v21 = vadd.f32 1.0, %v2666_v47  ;;  %v1353_v56 = vpack.c.bf16 %v1325_v61, %v1323_v59  ;;  %v2206_v23 = vmul.f32 -1.442695, %v3603_v49  ;;  %v3606_v58 = vpop.f32.mrb[22].mxu0  ;;  %v3635_v36 = vpop.f32.mrb[20].mxu1 }
 0x208   : > { %v2668_v25 = vpop.eup %2667  ;;  %2687 = vrcp.f32 %v1204_v50  ;;  %v2207_v51 = vmul.f32 -1.442695, %v3606_v58  ;;  %v3611_v63 = vpop.f32.mrb[23].mxu0 }
 0x209   : > { %v2670_v4 = vpop.eup %2669  ;;  %v1294_v6 = vmul.f32 %v2668_v25, %v3524_v12  ;;  %2689 = vrcp.f32 %v1205_v21  ;;  %v2208_v53 = vmul.f32 -1.442695, %v3611_v63  ;;  %1632 = vmatprep.mubr.bf16.mxu0 %v1353_v56 }
 0x20a   : > { %v2672_v8 = vpop.eup %2671  ;;  %v1295_v9 = vmul.f32 %v2670_v4, %v3527_v15  ;;  %2691 = vpow2.f32 %v2205_v0  ;;  %1633 = vmatmul.mubr.bf16.gmra.mrb[36].mxu0 %v1352_v52 }
 0x20b   : > { %v2674_v1 = vpop.eup %2673  ;;  %v1296_v11 = vmul.f32 %v2672_v8, %v3530_v17  ;;  %2693 = vpow2.f32 %v2206_v23  ;;  %v1326_v13 = vmul.f32 %v1294_v6, %v3552_v39 }
 0x20c   : > { %v2676_v12 = vpop.eup %2675  ;;  %v1297_v3 = vmul.f32 %v2674_v1, %v3535_v20  ;;  %2695 = vpow2.f32 %v2207_v51  ;;  %v1327_v5 = vmul.f32 %v1295_v9, %v3558_v44 }
 0x20d   : > { %v2678_v19 = vpop.eup %2677  ;;  %v1206_v22 = vadd.f32 1.0, %v2676_v12  ;;  %2697 = vpow2.f32 %v2208_v53  ;;  %v1328_v15 = vmul.f32 %v1296_v11, %v3562_v48  ;;  %v3627_v27 = vpop.f32.mrb[24].mxu0 }
 0x20e   : > { %v2680_v28 = vpop.eup %2679  ;;  %v1207_v29 = vadd.f32 1.0, %v2678_v19  ;;  %v1329_v17 = vmul.f32 %v1297_v3, %v3566_v54  ;;  %v3630_v31 = vpop.f32.mrb[25].mxu0  ;;  %v2209_v57 = vmul.f32 -1.442695, %v3627_v27 }
 0x20f   : > { %v2682_v39 = vpop.eup %2681  ;;  %2699 = vrcp.f32 %v1206_v22  ;;  %v1208_v33 = vadd.f32 1.0, %v2680_v28  ;;  %v1354_v20 = vpack.c.bf16 %v1328_v15, %v1326_v13  ;;  %v3633_v44 = vpop.f32.mrb[26].mxu0  ;;  %v2210_v40 = vmul.f32 -1.442695, %v3630_v31 }
 0x210   : > { %v2684_v37 = vpop.eup %2683  ;;  %2701 = vrcp.f32 %v1207_v29  ;;  %v1209_v48 = vadd.f32 1.0, %v2682_v39  ;;  %v1355_v59 = vpack.c.bf16 %v1329_v17, %v1327_v5  ;;  %v3638_v41 = vpop.f32.mrb[27].mxu0  ;;  %v2211_v46 = vmul.f32 -1.442695, %v3633_v44 }
 0x211   : > { %v3640_v54 = vpop.f32.mrb[21].mxu1  ;;  %v2686_v42 = vpop.eup %2685  ;;  %v1298_v45 = vmul.f32 %v2684_v37, %v3544_v32  ;;  %2703 = vrcp.f32 %v1208_v33  ;;  %v2212_v52 = vmul.f32 -1.442695, %v3638_v41 }
 0x212   : > { %v3644_v61 = vpop.f32.mrb[22].mxu1  ;;  %v2688_v47 = vpop.eup %2687  ;;  %v1299_v50 = vmul.f32 %v2686_v42, %v3547_v35  ;;  %2705 = vrcp.f32 %v1209_v48  ;;  %1642 = vmatprep.mubr.bf16.mxu0 %v1355_v59 }
 0x213   : > { %v3648_v0 = vpop.f32.mrb[23].mxu1  ;;  %v2690_v21 = vpop.eup %2689  ;;  %v1300_v56 = vmul.f32 %v2688_v47, %v3550_v38  ;;  %2707 = vpow2.f32 %v2209_v57  ;;  %v1330_v32 = vmul.f32 %v1298_v45, %v3580_v16  ;;  %1643 = vmatmul.mubr.bf16.gmra.mrb[40].mxu0 %v1354_v20 }
 0x214   : > { %v2692_v23 = vpop.eup %2691  ;;  %v1301_v25 = vmul.f32 %v2690_v21, %v3556_v43  ;;  %2709 = vpow2.f32 %v2210_v40  ;;  %v1331_v51 = vmul.f32 %v1299_v50, %v3586_v26  ;;  %v3663_v12 = vpop.f32.mrb[24].mxu1 }
 0x215   : > { %v2694_v35 = vpop.eup %2693  ;;  %v1210_v4 = vadd.f32 1.0, %v2692_v23  ;;  %2711 = vpow2.f32 %v2211_v46  ;;  %v1332_v6 = vmul.f32 %v1300_v56, %v3590_v30  ;;  %v3655_v53 = vpop.f32.mrb[28].mxu0 }
 0x216   : > { %v2696_v8 = vpop.eup %2695  ;;  %v1211_v9 = vadd.f32 1.0, %v2694_v35  ;;  %2713 = vpow2.f32 %v2212_v52  ;;  %v1333_v38 = vmul.f32 %v1301_v25, %v3594_v34  ;;  %v3658_v16 = vpop.f32.mrb[29].mxu0  ;;  %v2213_v26 = vmul.f32 -1.442695, %v3655_v53 }
 0x217   : > { %v2698_v1 = vpop.eup %2697  ;;  %2715 = vrcp.f32 %v1210_v4  ;;  %v1212_v43 = vadd.f32 1.0, %v2696_v8  ;;  %v1356_v11 = vpack.c.bf16 %v1332_v6, %v1330_v32  ;;  %v3661_v13 = vpop.f32.mrb[30].mxu0  ;;  %v2214_v5 = vmul.f32 -1.442695, %v3658_v16 }
 0x218   : > { %2717 = vrcp.f32 %v1211_v9  ;;  %v1213_v30 = vadd.f32 1.0, %v2698_v1  ;;  %v1357_v3 = vpack.c.bf16 %v1333_v38, %v1331_v51  ;;  %v3666_v19 = vpop.f32.mrb[31].mxu0  ;;  %v3668_v34 = vpop.f32.mrb[25].mxu1  ;;  %v2215_v15 = vmul.f32 -1.442695, %v3661_v13 }
 0x219   : > { %v2700_v22 = vpop.eup %2699  ;;  %2719 = vrcp.f32 %v1212_v43  ;;  %v3671_v28 = vpop.f32.mrb[26].mxu1  ;;  %v2216_v39 = vmul.f32 -1.442695, %v3666_v19 }
 0x21a   : > { %v2702_v29 = vpop.eup %2701  ;;  %v1302_v17 = vmul.f32 %v2700_v22, %v3572_v7  ;;  %2721 = vrcp.f32 %v1213_v30  ;;  %1652 = vmatprep.mubr.bf16.mxu0 %v1357_v3  ;;  %v3675_v33 = vpop.f32.mrb[27].mxu1 }
 0x21b   : > { %v2704_v20 = vpop.eup %2703  ;;  %v1303_v57 = vmul.f32 %v2702_v29, %v3575_v10  ;;  %2723 = vpow2.f32 %v2213_v26  ;;  %1653 = vmatmul.mubr.bf16.gmra.mrb[44].mxu0 %v1356_v11  ;;  %v3684_v21 = vpop.f32.mrb[28].mxu1 }
 0x21c   : > { %v2706_v37 = vpop.eup %2705  ;;  %v1304_v48 = vmul.f32 %v2704_v20, %v3578_v14  ;;  %2725 = vpow2.f32 %v2214_v5  ;;  %v1334_v59 = vmul.f32 %v1302_v17, %v3608_v60  ;;  %v3686_v32 = vpop.f32.mrb[29].mxu1 }
 0x21d   : > { %v2708_v40 = vpop.eup %2707  ;;  %v1305_v7 = vmul.f32 %v2706_v37, %v3584_v24  ;;  %2727 = vpow2.f32 %v2215_v15  ;;  %v1335_v42 = vmul.f32 %v1303_v57, %v3613_v2  ;;  %v1089_v25 = vpop.f32.mrb[30].mxu1 }
 0x21e   : > { %v2710_v45 = vpop.eup %2709  ;;  %v1214_v46 = vadd.f32 1.0, %v2708_v40  ;;  %2729 = vpow2.f32 %v2216_v39  ;;  %v1336_v47 = vmul.f32 %v1304_v48, %v3617_v62  ;;  %v1091_v35 = vpop.f32.mrb[31].mxu1 }
 0x21f   : > { %v2712_v10 = vpop.eup %2711  ;;  %v1215_v50 = vadd.f32 1.0, %v2710_v45  ;;  %v1337_v52 = vmul.f32 %v1305_v7, %v3620_v55 }
 0x220   : > { %v2714_v14 = vpop.eup %2713  ;;  %2731 = vrcp.f32 %v1214_v46  ;;  %v1216_v60 = vadd.f32 1.0, %v2712_v10  ;;  %v1358_v56 = vpack.c.bf16 %v1336_v47, %v1334_v59 }
 0x221   : > { %v2716_v24 = vpop.eup %2715  ;;  %2733 = vrcp.f32 %v1215_v50  ;;  %v1217_v2 = vadd.f32 1.0, %v2714_v14  ;;  %v1359_v23 = vpack.c.bf16 %v1337_v52, %v1335_v42  ;;  %v1367_v52 = vld [vmem:[#allocation2 + $0x8] sm:$0xff]  ;;  %v1368_v14 = vld [vmem:[#allocation2 + $0x10] sm:$0xff] }
 0x222   : > { %v2718_v51 = vpop.eup %2717  ;;  %v1306_v62 = vmul.f32 %v2716_v24, %v3600_v18  ;;  %2735 = vrcp.f32 %v1216_v60 }
 0x223   : > { %v2720_v4 = vpop.eup %2719  ;;  %v1307_v55 = vmul.f32 %v2718_v51, %v3603_v49  ;;  %2737 = vrcp.f32 %v1217_v2  ;;  %1662 = vmatprep.mubr.bf16.mxu1 %v1359_v23  ;;  %v1370_v23 = vld [vmem:[#allocation2 + $0x20] sm:$0xff] }
 0x224   : > { %v2722_v6 = vpop.eup %2721  ;;  %v1308_v8 = vmul.f32 %v2720_v4, %v3606_v58  ;;  %v1338_v9 = vmul.f32 %v1306_v62, %v3635_v36  ;;  %1663 = vmatmul.mubr.bf16.vlgmr.msra.gmra.mrb[32].mxu1 %v1358_v56  ;;  %v1372_v62 = vld [vmem:[#allocation2 + $0x30] sm:$0xff] }
 0x225   : > { %v2724_v38 = vpop.eup %2723  ;;  %v1309_v1 = vmul.f32 %v2722_v6, %v3611_v63  ;;  %v1339_v43 = vmul.f32 %v1307_v55, %v3640_v54  ;;  %v1373_v55 = vld [vmem:[#allocation2 + $0x38] sm:$0xff] }
 0x226   : > { %v2726_v11 = vpop.eup %2725  ;;  %v1218_v18 = vadd.f32 1.0, %v2724_v38  ;;  %v1340_v26 = vmul.f32 %v1308_v8, %v3644_v61 }
 0x227   : > { %v2728_v30 = vpop.eup %2727  ;;  %v1219_v3 = vadd.f32 1.0, %v2726_v11  ;;  %v1341_v49 = vmul.f32 %v1309_v1, %v3648_v0  ;;  %v1375_v11 = vld [vmem:[#allocation2 + $0x48] sm:$0xff] }
 0x228   : > { %v2730_v5 = vpop.eup %2729  ;;  %2739 = vrcp.f32 %v1218_v18  ;;  %v1220_v22 = vadd.f32 1.0, %v2728_v30  ;;  %v1360_v58 = vpack.c.bf16 %v1340_v26, %v1338_v9  ;;  %v1376_v26 = vld [vmem:[#allocation2 + $0x50] sm:$0xff] }
 0x229   : > { %2741 = vrcp.f32 %v1219_v3  ;;  %v1221_v36 = vadd.f32 1.0, %v2730_v5  ;;  %v1361_v15 = vpack.c.bf16 %v1341_v49, %v1339_v43  ;;  %v1374_v43 = vld [vmem:[#allocation2 + $0x40] sm:$0xff]  ;;  %v1377_v49 = vld [vmem:[#allocation2 + $0x58] sm:$0xff] }
 0x22a   : > { %v2732_v29 = vpop.eup %2731  ;;  %2743 = vrcp.f32 %v1220_v22 }
 0x22b   : > { %v2734_v63 = vpop.eup %2733  ;;  %v1310_v54 = vmul.f32 %v2732_v29, %v3627_v27  ;;  %2745 = vrcp.f32 %v1221_v36  ;;  %1672 = vmatprep.mubr.bf16.mxu1 %v1361_v15  ;;  %v1378_v29 = vld [vmem:[#allocation2 + $0x60] sm:$0xff] }
 0x22c   : > { %v2736_v17 = vpop.eup %2735  ;;  %v1311_v61 = vmul.f32 %v2734_v63, %v3630_v31  ;;  %1673 = vmatmul.mubr.bf16.gmra.mrb[36].mxu1 %v1360_v58  ;;  %v1379_v63 = vld [vmem:[#allocation2 + $0x68] sm:$0xff] }
 0x22d   : > { %v2738_v39 = vpop.eup %2737  ;;  %v1312_v0 = vmul.f32 %v2736_v17, %v3633_v44  ;;  %v1342_v20 = vmul.f32 %v1310_v54, %v3663_v12  ;;  %v1380_v17 = vld [vmem:[#allocation2 + $0x70] sm:$0xff] }
 0x22e   : > { %v1313_v57 = vmul.f32 %v2738_v39, %v3638_v41  ;;  %v1343_v37 = vmul.f32 %v1311_v61, %v3668_v34 }
 0x22f   : > { %v1344_v48 = vmul.f32 %v1312_v0, %v3671_v28  ;;  %v1381_v0 = vld [vmem:[#allocation2 + $0x78] sm:$0xff] }
 0x230   : > { %v1345_v59 = vmul.f32 %v1313_v57, %v3675_v33 }
 0x231   : > { %v1362_v27 = vpack.c.bf16 %v1344_v48, %v1342_v20 }
 0x232   : > { %v2740_v40 = vpop.eup %2739  ;;  %v1363_v7 = vpack.c.bf16 %v1345_v59, %v1343_v37 }
 0x233   : > { %v2742_v42 = vpop.eup %2741  ;;  %v1314_v31 = vmul.f32 %v2740_v40, %v3655_v53  ;;  %v1366_v53 = vld [vmem:[#allocation2] sm:$0xff]  ;;  %v1383_v40 = vld [vmem:[#allocation2 + $0x88] sm:$0xff] }
 0x234   : > { %v2744_v45 = vpop.eup %2743  ;;  %v1315_v46 = vmul.f32 %v2742_v42, %v3658_v16  ;;  %1682 = vmatprep.mubr.bf16.mxu1 %v1363_v7  ;;  %v1384_v42 = vld [vmem:[#allocation2 + $0x90] sm:$0xff] }
 0x235   : > { %v2746_v44 = vpop.eup %2745  ;;  %v1316_v12 = vmul.f32 %v2744_v45, %v3661_v13  ;;  %v1346_v41 = vmul.f32 %v1314_v31, %v3684_v21  ;;  %1683 = vmatmul.mubr.bf16.gmra.mrb[40].mxu1 %v1362_v27  ;;  %v1369_v13 = vld [vmem:[#allocation2 + $0x18] sm:$0xff]  ;;  %v1382_v27 = vld [vmem:[#allocation2 + $0x80] sm:$0xff] }
 0x236   : > { %v1317_v34 = vmul.f32 %v2746_v44, %v3666_v19  ;;  %v1347_v28 = vmul.f32 %v1315_v46, %v3686_v32  ;;  %v1385_v46 = vld [vmem:[#allocation2 + $0x98] sm:$0xff] }
 0x237   : > { %v1348_v33 = vmul.f32 %v1316_v12, %v1089_v25  ;;  %v1371_v25 = vld [vmem:[#allocation2 + $0x28] sm:$0xff] }
 0x238   : > { %v1349_v47 = vmul.f32 %v1317_v34, %v1091_v35 }
 0x239   : > { %v1364_v10 = vpack.c.bf16 %v1348_v33, %v1346_v41  ;;  %v1386_v33 = vld [vmem:[#allocation2 + $0xa0] sm:$0xff] }
 0x23a   : > { %v1365_v50 = vpack.c.bf16 %v1349_v47, %v1347_v28  ;;  %v1387_v47 = vld [vmem:[#allocation2 + $0xa8] sm:$0xff] }
 0x23c   : > { %1692 = vmatprep.mubr.bf16.mxu1 %v1365_v50  ;;  %v1388_v50 = vld [vmem:[#allocation2 + $0xb0] sm:$0xff] }
 0x23d   : > { %1693 = vmatmul.mubr.bf16.gmra.mrb[44].mxu1 %v1364_v10 }
 0x2d5   : > { %v1624_v16 = vpop.f32.mrb[32].mxu0 }
 0x2d6   : > { %v1703_v60 = vadd.f32 %v1624_v16, %v1366_v53  ;;  %v1626_v56 = vpop.f32.mrb[33].mxu0  ;;  %v1389_v16 = vld [vmem:[#allocation2 + $0xb8] sm:$0xff] }
 0x2d7   : > { %v1704_v24 = vadd.f32 %v1626_v56, %v1367_v52  ;;  %v1628_v21 = vpop.f32.mrb[34].mxu0 }
 0x2d8   : > { %1735 = vst [vmem:[#allocation2] sm:$0xff] %v1703_v60  ;;  %v1705_v2 = vadd.f32 %v1628_v21, %v1368_v14  ;;  %v1630_v19 = vpop.f32.mrb[35].mxu0  ;;  %v1390_v21 = vld [vmem:[#allocation2 + $0xc0] sm:$0xff] }
 0x2d9   : > { %1736 = vst [vmem:[#allocation2 + $0x8] sm:$0xff] %v1704_v24  ;;  %v1706_v32 = vadd.f32 %v1630_v19, %v1369_v13 }
 0x2da   : > { %1737 = vst [vmem:[#allocation2 + $0x10] sm:$0xff] %v1705_v2  ;;  %v1391_v2 = vld [vmem:[#allocation2 + $0xc8] sm:$0xff] }
 0x2db   : > { %1738 = vst [vmem:[#allocation2 + $0x18] sm:$0xff] %v1706_v32  ;;  %v1392_v32 = vld [vmem:[#allocation2 + $0xd0] sm:$0xff] }
 0x2dd   : > { %v1634_v51 = vpop.f32.mrb[36].mxu0 }
 0x2de   : > { %v1707_v35 = vadd.f32 %v1634_v51, %v1370_v23  ;;  %v1636_v4 = vpop.f32.mrb[37].mxu0  ;;  %v1393_v51 = vld [vmem:[#allocation2 + $0xd8] sm:$0xff] }
 0x2df   : > { %v1708_v6 = vadd.f32 %v1636_v4, %v1371_v25  ;;  %v1638_v8 = vpop.f32.mrb[38].mxu0 }
 0x2e0   : > { %1739 = vst [vmem:[#allocation2 + $0x20] sm:$0xff] %v1707_v35  ;;  %v1709_v9 = vadd.f32 %v1638_v8, %v1372_v62  ;;  %v1640_v38 = vpop.f32.mrb[39].mxu0  ;;  %v1394_v8 = vld [vmem:[#allocation2 + $0xe0] sm:$0xff] }
 0x2e1   : > { %1740 = vst [vmem:[#allocation2 + $0x28] sm:$0xff] %v1708_v6  ;;  %v1710_v1 = vadd.f32 %v1640_v38, %v1373_v55 }
 0x2e2   : > { %1741 = vst [vmem:[#allocation2 + $0x30] sm:$0xff] %v1709_v9  ;;  %v1395_v9 = vld [vmem:[#allocation2 + $0xe8] sm:$0xff] }
 0x2e3   : > { %1742 = vst [vmem:[#allocation2 + $0x38] sm:$0xff] %v1710_v1  ;;  %v1396_v1 = vld [vmem:[#allocation2 + $0xf0] sm:$0xff] }
 0x2e6   : > { %v1644_v18 = vpop.f32.mrb[40].mxu0 }
 0x2e7   : > { %v1711_v30 = vadd.f32 %v1644_v18, %v1374_v43  ;;  %v1646_v3 = vpop.f32.mrb[41].mxu0  ;;  %v1397_v18 = vld [vmem:[#allocation2 + $0xf8] sm:$0xff] }
 0x2e8   : > { %v1712_v5 = vadd.f32 %v1646_v3, %v1375_v11  ;;  %v1648_v22 = vpop.f32.mrb[42].mxu0 }
 0x2e9   : > { %1743 = vst [vmem:[#allocation2 + $0x40] sm:$0xff] %v1711_v30  ;;  %v1713_v58 = vadd.f32 %v1648_v22, %v1376_v26  ;;  %v1650_v36 = vpop.f32.mrb[43].mxu0  ;;  %v1771_v22 = vld [vmem:[#allocation2] sm:$0xff] (!%p2249_p5) }
 0x2ea   : > { %1744 = vst [vmem:[#allocation2 + $0x48] sm:$0xff] %v1712_v5  ;;  %v1714_v15 = vadd.f32 %v1650_v36, %v1377_v49  ;;  %v1773_v36 = vld [vmem:[#allocation2 + $0x10] sm:$0xff] (!%p2249_p5) }
 0x2eb   : > { %1745 = vst [vmem:[#allocation2 + $0x50] sm:$0xff] %v1713_v58  ;;  %v1772_v58 = vld [vmem:[#allocation2 + $0x8] sm:$0xff] (!%p2249_p5) }
 0x2ec   : > { %1746 = vst [vmem:[#allocation2 + $0x58] sm:$0xff] %v1714_v15  ;;  %v2278_v15 = vpack.c.bf16 (!%p2249_p5), %v1772_v58, %v1771_v22 }
 0x2ee   : > { %v1654_v54 = vpop.f32.mrb[44].mxu0  ;;  %1899 = vst [vmem:[%s3377_s30] sm:$0xff] (!%p2249_p5), %v2278_v15 }
 0x2ef   : > { %v1715_v61 = vadd.f32 %v1654_v54, %v1378_v29  ;;  %v1656_v39 = vpop.f32.mrb[45].mxu0  ;;  %v1774_v29 = vld [vmem:[#allocation2 + $0x18] sm:$0xff] (!%p2249_p5)  ;;  %v1776_v54 = vld [vmem:[#allocation2 + $0x28] sm:$0xff] (!%p2249_p5) }
 0x2f0   : > { %v1716_v20 = vadd.f32 %v1656_v39, %v1379_v63  ;;  %v1658_v57 = vpop.f32.mrb[46].mxu0  ;;  %v1775_v63 = vld [vmem:[#allocation2 + $0x20] sm:$0xff] (!%p2249_p5)  ;;  %v1777_v39 = vld [vmem:[#allocation2 + $0x30] sm:$0xff] (!%p2249_p5) }
 0x2f1   : > { %1747 = vst [vmem:[#allocation2 + $0x60] sm:$0xff] %v1715_v61  ;;  %v1717_v37 = vadd.f32 %v1658_v57, %v1380_v17  ;;  %v1660_v48 = vpop.f32.mrb[47].mxu0  ;;  %v2279_v17 = vpack.c.bf16 (!%p2249_p5), %v1774_v29, %v1773_v36  ;;  %v2280_v61 = vpack.c.bf16 (!%p2249_p5), %v1776_v54, %v1775_v63 }
 0x2f2   : > { %1748 = vst [vmem:[#allocation2 + $0x68] sm:$0xff] %v1716_v20  ;;  %v1718_v59 = vadd.f32 %v1660_v48, %v1381_v0  ;;  %v1778_v0 = vld [vmem:[#allocation2 + $0x38] sm:$0xff] (!%p2249_p5)  ;;  %v1779_v20 = vld [vmem:[#allocation2 + $0x40] sm:$0xff] (!%p2249_p5)  ;;  %v1781_v48 = vld [vmem:[#allocation2 + $0x50] sm:$0xff] (!%p2249_p5) }
 0x2f3   : > { %1749 = vst [vmem:[#allocation2 + $0x70] sm:$0xff] %v1717_v37  ;;  %v2281_v57 = vpack.c.bf16 (!%p2249_p5), %v1778_v0, %v1777_v39  ;;  %v1780_v37 = vld [vmem:[#allocation2 + $0x48] sm:$0xff] (!%p2249_p5)  ;;  %1900 = vst [vmem:[%s3377_s30 + $0x8] sm:$0xff] (!%p2249_p5), %v2279_v17 }
 0x2f4   : > { %1750 = vst [vmem:[#allocation2 + $0x78] sm:$0xff] %v1718_v59  ;;  %v1782_v59 = vld [vmem:[#allocation2 + $0x58] sm:$0xff] (!%p2249_p5)  ;;  %1901 = vst [vmem:[%s3377_s30 + $0x10] sm:$0xff] (!%p2249_p5), %v2280_v61 }
 0x2f5   : > { %1902 = vst [vmem:[%s3377_s30 + $0x18] sm:$0xff] (!%p2249_p5), %v2281_v57 }
 0x2f7   : > { %v1664_v7 = vpop.f32.mrb[32].mxu1 }
 0x2f8   : > { %v1719_v31 = vadd.f32 %v1664_v7, %v1382_v27  ;;  %v1666_v45 = vpop.f32.mrb[33].mxu1  ;;  %v2282_v27 = vpack.c.bf16 (!%p2249_p5), %v1780_v37, %v1779_v20  ;;  %v1783_v7 = vld [vmem:[#allocation2 + $0x60] sm:$0xff] (!%p2249_p5) }
 0x2f9   : > { %v1720_v44 = vadd.f32 %v1666_v45, %v1383_v40  ;;  %v1668_v12 = vpop.f32.mrb[34].mxu1  ;;  %v2283_v40 = vpack.c.bf16 (!%p2249_p5), %v1782_v59, %v1781_v48 }
 0x2fa   : > { %1751 = vst [vmem:[#allocation2 + $0x80] sm:$0xff] %v1719_v31  ;;  %v1721_v41 = vadd.f32 %v1668_v12, %v1384_v42  ;;  %v1670_v34 = vpop.f32.mrb[35].mxu1  ;;  %v1784_v42 = vld [vmem:[#allocation2 + $0x68] sm:$0xff] (!%p2249_p5)  ;;  %v1785_v31 = vld [vmem:[#allocation2 + $0x70] sm:$0xff] (!%p2249_p5)  ;;  %1903 = vst [vmem:[%s3377_s30 + $0x20] sm:$0xff] (!%p2249_p5), %v2282_v27 }
 0x2fb   : > { %1752 = vst [vmem:[#allocation2 + $0x88] sm:$0xff] %v1720_v44  ;;  %v1722_v28 = vadd.f32 %v1670_v34, %v1385_v46  ;;  %v2284_v45 = vpack.c.bf16 (!%p2249_p5), %v1784_v42, %v1783_v7  ;;  %v1786_v46 = vld [vmem:[#allocation2 + $0x78] sm:$0xff] (!%p2249_p5)  ;;  %1904 = vst [vmem:[%s3377_s30 + $0x28] sm:$0xff] (!%p2249_p5), %v2283_v40 }
 0x2fc   : > { %1753 = vst [vmem:[#allocation2 + $0x90] sm:$0xff] %v1721_v41  ;;  %v2285_v41 = vpack.c.bf16 (!%p2249_p5), %v1786_v46, %v1785_v31 }
 0x2fd   : > { %1754 = vst [vmem:[#allocation2 + $0x98] sm:$0xff] %v1722_v28  ;;  %1905 = vst [vmem:[%s3377_s30 + $0x30] sm:$0xff] (!%p2249_p5), %v2284_v45 }
 0x2fe   : > { %1906 = vst [vmem:[%s3377_s30 + $0x38] sm:$0xff] (!%p2249_p5), %v2285_v41 }
 0x2ff   : > { %v1674_v10 = vpop.f32.mrb[36].mxu1 }
 0x300   : > { %v1723_v53 = vadd.f32 %v1674_v10, %v1386_v33  ;;  %v1676_v52 = vpop.f32.mrb[37].mxu1 }
 0x301   : > { %v1724_v14 = vadd.f32 %v1676_v52, %v1387_v47  ;;  %v1678_v60 = vpop.f32.mrb[38].mxu1  ;;  %v1787_v44 = vld [vmem:[#allocation2 + $0x80] sm:$0xff] (!%p2249_p5) }
 0x302   : > { %1755 = vst [vmem:[#allocation2 + $0xa0] sm:$0xff] %v1723_v53  ;;  %v1725_v56 = vadd.f32 %v1678_v60, %v1388_v50  ;;  %v1680_v13 = vpop.f32.mrb[39].mxu1  ;;  %v1788_v12 = vld [vmem:[#allocation2 + $0x88] sm:$0xff] (!%p2249_p5) }
 0x303   : > { %1756 = vst [vmem:[#allocation2 + $0xa8] sm:$0xff] %v1724_v14  ;;  %v1726_v24 = vadd.f32 %v1680_v13, %v1389_v16  ;;  %v2286_v34 = vpack.c.bf16 (!%p2249_p5), %v1788_v12, %v1787_v44  ;;  %v1789_v28 = vld [vmem:[#allocation2 + $0x90] sm:$0xff] (!%p2249_p5) }
 0x304   : > { %1757 = vst [vmem:[#allocation2 + $0xb0] sm:$0xff] %v1725_v56  ;;  %v1790_v33 = vld [vmem:[#allocation2 + $0x98] sm:$0xff] (!%p2249_p5) }
 0x305   : > { %1758 = vst [vmem:[#allocation2 + $0xb8] sm:$0xff] %v1726_v24  ;;  %v2287_v10 = vpack.c.bf16 (!%p2249_p5), %v1790_v33, %v1789_v28  ;;  %1907 = vst [vmem:[%s3377_s30 + $0x40] sm:$0xff] (!%p2249_p5), %v2286_v34 }
 0x307   : > { %1908 = vst [vmem:[%s3377_s30 + $0x48] sm:$0xff] (!%p2249_p5), %v2287_v10 }
 0x308   : > { %v1684_v19 = vpop.f32.mrb[40].mxu1 }
 0x309   : > { %v1727_v23 = vadd.f32 %v1684_v19, %v1390_v21  ;;  %v1686_v25 = vpop.f32.mrb[41].mxu1  ;;  %v1791_v47 = vld [vmem:[#allocation2 + $0xa0] sm:$0xff] (!%p2249_p5) }
 0x30a   : > { %v1728_v62 = vadd.f32 %v1686_v25, %v1391_v2  ;;  %v1688_v35 = vpop.f32.mrb[42].mxu1  ;;  %v1792_v50 = vld [vmem:[#allocation2 + $0xa8] sm:$0xff] (!%p2249_p5) }
 0x30b   : > { %1759 = vst [vmem:[#allocation2 + $0xc0] sm:$0xff] %v1727_v23  ;;  %v1729_v4 = vadd.f32 %v1688_v35, %v1392_v32  ;;  %v1690_v55 = vpop.f32.mrb[43].mxu1  ;;  %v1793_v53 = vld [vmem:[#allocation2 + $0xb0] sm:$0xff] (!%p2249_p5)  ;;  %v2288_v16 = vpack.c.bf16 (!%p2249_p5), %v1792_v50, %v1791_v47 }
 0x30c   : > { %1760 = vst [vmem:[#allocation2 + $0xc8] sm:$0xff] %v1728_v62  ;;  %v1730_v6 = vadd.f32 %v1690_v55, %v1393_v51  ;;  %v1794_v52 = vld [vmem:[#allocation2 + $0xb8] sm:$0xff] (!%p2249_p5) }
 0x30d   : > { %1761 = vst [vmem:[#allocation2 + $0xd0] sm:$0xff] %v1729_v4  ;;  %v2289_v14 = vpack.c.bf16 (!%p2249_p5), %v1794_v52, %v1793_v53  ;;  %1909 = vst [vmem:[%s3377_s30 + $0x50] sm:$0xff] (!%p2249_p5), %v2288_v16 }
 0x30e   : > { %1762 = vst [vmem:[#allocation2 + $0xd8] sm:$0xff] %v1730_v6 }
 0x30f   : > { %1910 = vst [vmem:[%s3377_s30 + $0x58] sm:$0xff] (!%p2249_p5), %v2289_v14 }
 0x310   : > { %v1694_v38 = vpop.f32.mrb[44].mxu1  ;;  %1770 = sbr.rel (%p2249_p5) target bundleno = 801 (0x321), region = 60 }
 0x311   : > { %v1731_v43 = vadd.f32 %v1694_v38, %v1394_v8  ;;  %v1696_v11 = vpop.f32.mrb[45].mxu1 }
 0x312   : > { %v1732_v26 = vadd.f32 %v1696_v11, %v1395_v9  ;;  %v1698_v30 = vpop.f32.mrb[46].mxu1  ;;  %v1795_v60 = vld [vmem:[#allocation2 + $0xc0] sm:$0xff] (!%p2249_p5) }
 0x313   : > { %1763 = vst [vmem:[#allocation2 + $0xe0] sm:$0xff] %v1731_v43  ;;  %v1733_v3 = vadd.f32 %v1698_v30, %v1396_v1  ;;  %v1700_v49 = vpop.f32.mrb[47].mxu1  ;;  %v1796_v56 = vld [vmem:[#allocation2 + $0xc8] sm:$0xff] (!%p2249_p5) }
 0x314   : > { %1764 = vst [vmem:[#allocation2 + $0xe8] sm:$0xff] %v1732_v26  ;;  %v1734_v5 = vadd.f32 %v1700_v49, %v1397_v18  ;;  %v1797_v13 = vld [vmem:[#allocation2 + $0xd0] sm:$0xff] (!%p2249_p5)  ;;  %v2290_v24 = vpack.c.bf16 (!%p2249_p5), %v1796_v56, %v1795_v60 }
 0x315   : > { %1765 = vst [vmem:[#allocation2 + $0xf0] sm:$0xff] %v1733_v3  ;;  %v1798_v21 = vld [vmem:[#allocation2 + $0xd8] sm:$0xff] (!%p2249_p5) }
 0x316   : > { %1766 = vst [vmem:[#allocation2 + $0xf8] sm:$0xff] %v1734_v5  ;;  %v2291_v32 = vpack.c.bf16 (!%p2249_p5), %v1798_v21, %v1797_v13  ;;  %1911 = vst [vmem:[%s3377_s30 + $0x60] sm:$0xff] (!%p2249_p5), %v2290_v24 }
 0x318   : > { %1912 = vst [vmem:[%s3377_s30 + $0x68] sm:$0xff] %v2291_v32 }
 0x31a   : > { %v1799_v2 = vld [vmem:[#allocation2 + $0xe0] sm:$0xff] }
 0x31b   : > { %v1800_v19 = vld [vmem:[#allocation2 + $0xe8] sm:$0xff] }
 0x31c   : > { %v2292_v23 = vpack.c.bf16 %v1800_v19, %v1799_v2  ;;  %v1801_v25 = vld [vmem:[#allocation2 + $0xf0] sm:$0xff] }
 0x31d   : > { %v1802_v51 = vld [vmem:[#allocation2 + $0xf8] sm:$0xff] }
 0x31e   : > { %v2293_v62 = vpack.c.bf16 %v1802_v51, %v1801_v25  ;;  %1913 = vst [vmem:[%s3377_s30 + $0x70] sm:$0xff] %v2292_v23 }
 0x320   : > { %1914 = vst [vmem:[%s3377_s30 + $0x78] sm:$0xff] %v2293_v62 }
 0x321 PF: > { %s3863_s7 = sld [smem:[#allocation19_spill]]  ;;  %s3864_s26 = sld [smem:[#allocation27_spill]] }
 0x322   : > { %s1930_s9 = sshll.u32 %s3377_s30, 4  ;;  %s1916_s14 = scalar_lea.sflag [#allocation5], %s3351_s12  ;;  %s3734_s9 = int_to_ptr.vmem [resolvable:$true] %s1930_s9 }
 0x323   : > { %s2867_s20 = scalar_lea.vmem %s3734_s9, 2048  ;;  %p3865_p3 = scmp.ne.s32.totalorder %s3846_s6, 0 }
 0x324   : > { %p2868_p6 = scmp.ne.s32.totalorder %s3734_s9, %s2867_s20  ;;  %s3007_s8 = smov [#allocation11]  }
 0x325   : > { %s2871_s29 = sshll.u32 %s3007_s8, 4  ;;  %s2872_s29 = int_to_ptr.vmem [resolvable:$false] %s2871_s29 }
 0x326   : > { %p2869_p7 = pnand %p2868_p6, %p3865_p3  ;;  %s2873_s28 = scalar_lea.vmem %s2872_s29, 4096 }
 0x327   : > { %s2295_s4 = sshll.u32 %s3863_s7, 11  ;;  %p2874_p2 = scmp.lt.s32.totalorder %s3734_s9, %s2872_s29 }
 0x328   : > { %s3731_s1 = scalar_lea.hbm %s3864_s26, %s2295_s4  ;;  %p2870_p12 = pneg %p2869_p7 }
 0x329   : > { %p2875_p13 = scmp.lt.s32.totalorder %s2873_s28, %s2867_s20 }
 0x32b   : > { %p2876_p8 = por %p2875_p13, %p2874_p2 }
 0x32d   : > { %p2877_p4 = pnand %p2876_p8, %p2870_p12 }
 0x32f   : > { %2880 = shalt.err (!%p2877_p4)
}
 0x330   : > { %s2881_s5 = scalar_lea.hbm %s3731_s1, 2048  ;;  %s2885_s16 = scalar_lea.hbm %s3864_s26, 4096 }
 0x331   : > { %p2882_p10 = scmp.ne.s32.totalorder %s3731_s1, %s2881_s5  ;;  %p2886_p0 = scmp.lt.u32.totalorder %s3731_s1, %s3864_s26 }
 0x332   : > { %p2887_p1 = scmp.lt.u32.totalorder %s2885_s16, %s2881_s5  ;;  %p2889_p6 = scmp.lt.u32.totalorder %s2881_s5, %s3731_s1 }
 0x333   : > { %p2883_p9 = pnand %p2882_p10, %p3865_p3 }
 0x334   : > { %p2888_p5 = por %p2887_p1, %p2886_p0 }
 0x335   : > { %p2884_p11 = pneg %p2883_p9 }
 0x336   : > { %p2890_p7 = por %p2889_p6, %p2888_p5 }
 0x338   : > { %p2891_p12 = pnand %p2890_p7, %p2884_p11 }
 0x33a   : > { %2894 = shalt.err (!%p2891_p12)
}
 0x33b   : > { %s3008_s15 = smov 128   ;;  %s3009_s11 = smov 8  }
 0x33c   : > { %2336 = dma.vmem_to_hbm [thread:$0]  (%p3865_p3), %s3734_s9, 2048, %s3731_s1, %s1916_s14, %s3008_s15, %s3008_s15, %s3009_s11  }
 0x33d PF: > { %p2356_p2 = scmp.ge.s32.totalorder %s2997_s25, 2  ;;  %s1945_s7 = sand.u32 1, %s2969_s18  }
 0x33e   : > { %p3866_p13 = scmp.ne.s32.totalorder %s3848_s22, 0  ;;  %s1946_s4 = scalar_lea.sflag [#allocation5], %s1945_s7 }
 0x340   : > { %p2352_p8 = pnand %p2356_p2, %p3866_p13 }
 0x342   : > { %2952 = dma.done.wait (!%p2352_p8), %s1946_s4, 2048  }
 0x343   : > { %2954 = vsyncadd (!%p2352_p8), %s1946_s4, 4294965248  ;;  %s26_s25 = sadd.s32 1, %s2997_s25   ;;  %s3867_s15 = sld [smem:[#allocation16_spill]] }
 0x344   : > { %p23_p4 = scmp.ge.s32.totalorder %s26_s25, 6   ;;  %s3868_s24 = sld [smem:[#allocation22_spill]] }
 0x345   : > { %s3869_s6 = sld [smem:[#allocation17_spill]]  ;;  %s3870_s20 = sld [smem:[#allocation25_spill]] }
 0x346   : > { %s3871_s22 = sld [smem:[#allocation20_spill]]  ;;  %s3872_s12 = sld [smem:[#allocation21_spill]] }
 0x347   : > { %s3873_s13 = sld [smem:[#allocation23_spill]]  ;;  %s3874_s16 = smov %s2965_s17 }
 0x348   : > { %s3876_s18 = smov %s2973_s19  ;;  %s3878_s21 = smov %s2989_s23 }
 0x349   :  { %25 = sbr.rel (!%p23_p4) target bundleno = 16 (0x10), region = 126 }
 0x34a   : > { %s3875_s17 = smov %s3868_s24 }
 0x34b   : > { %s3877_s19 = smov %s3869_s6 }
 0x34c   : > { %s3879_s23 = smov %s3872_s12 }
 0x34d   : > { %s3880_s24 = smov %s3873_s13 }
 0x350   :  { %1951 = vsyncpa [#allocation4], 1 }
 0x351   :  { %1953 = vsyncpa [#allocation4 + $0x1], 1 }
 0x352   :  { %1954 = vsyncpa [#allocation7], 1 }
 0x353   :  { %1956 = vsyncpa [#allocation7 + $0x1], 1 }
 0x354   :  { %1957 = vsyncpa [#allocation10], 1 }
 0x355   :  { %1959 = vsyncpa [#allocation10 + $0x1], 1 }
 0x356   :  { %1960 = vsyncpa [#allocation5], 1 }
 0x357   :  { %1962 = vsyncpa [#allocation5 + $0x1], 1 }

</bundles_post_ra>
